<compile_context>
chip_gen: v6e
topology: v6e:2x2x1
jax: 0.10.0
libtpu: 0.0.40
codegen_flags: <defaults>
</compile_context>

<pallas_src>
import jax
import jax.numpy as jnp
from jax.experimental import pallas as pl
from jax.experimental.pallas import tpu as pltpu

# Model shapes (module-consistent, small).
N = 16            # nodes (tiles) per graph
F = 64            # num_features
H = 32            # hidden_dim
C = 2             # n_classes
KNN = 8           # k nearest neighbours

# Batching / tiling.
GC = 8            # graphs per grid step -> RN = 128 MXU rows per chunk
RN = GC * N       # 128
B_TOTAL = 16      # total graphs in the example batch
NUM_CHUNKS = B_TOTAL // GC
OUT_LANES = 128   # lane-dense (padded) logits width

# Row offsets inside the packed bf16 weight slab (all multiples of 16 ->
# aligned with the bf16 (16, 128) sublane tile).
R_W1A, R_W1B, R_W2A, R_W2B = 0, 64, 96, 128
R_W3A, R_W3B, R_WR, R_WAB, R_WOUT = 160, 192, 224, 256, 288
W_ROWS = 320
B_ROWS = 16


def _dgcn_kernel(x_ref, adj_ref, w_ref, b_ref, out_ref):
    f32, bf16 = jnp.float32, jnp.bfloat16

    x = x_ref[...]        # (RN, F)  bf16 node features for this chunk of graphs
    adj = adj_ref[...]    # (RN, RN) bf16 block-diag kNN adjacency, self term (I) folded in

    def w_at(r0, rows, cols):          # static slice of the packed bf16 weight slab
        return w_ref[r0:r0 + rows, 0:cols]

    def b_at(r, cols):                 # one packed f32 bias row -> (1, cols)
        return b_ref[r:r + 1, 0:cols]

    def lin(h, w, b):                  # bf16 MXU matmul, f32 accumulation, f32 bias
        return jnp.dot(h.astype(bf16), w, preferred_element_type=f32) + b

    def gin_relu(h, wA, bA, wB, bB):
        # GINConv(eps=0) with the self term folded into adj: agg = (A + I) @ h.
        agg = jnp.dot(adj, h.astype(bf16), preferred_element_type=f32)
        z = jnp.maximum(lin(agg, wA, bA), 0.0)   # Linear -> ReLU (MLP inner)
        return jnp.maximum(lin(z, wB, bB), 0.0)  # Linear -> outer F.relu

    x1 = gin_relu(x,  w_at(R_W1A, F, H), b_at(0, H), w_at(R_W1B, H, H), b_at(1, H))
    x2 = gin_relu(x1, w_at(R_W2A, H, H), b_at(2, H), w_at(R_W2B, H, H), b_at(3, H))
    x3 = gin_relu(x2, w_at(R_W3A, H, H), b_at(4, H), w_at(R_W3B, H, H), b_at(5, H))  # (RN,H) f32

    # --- AttentionGate (dropout = identity in eval mode) --------------------
    # Fused Wa|Wb projection: one (RN, 2H) matmul, halves through tanh / sigmoid.
    ab = lin(x3, w_at(R_WAB, H, 2 * H), b_at(6, 2 * H))        # (RN, 2H) f32
    a_gate = jnp.tanh(ab[:, :H])
    b_gate = jax.nn.sigmoid(ab[:, H:2 * H])
    g = a_gate * b_gate                                        # (RN, H) f32

    # attention_c (K=1) as a VPU multiply + lane reduction (no 1-lane MXU matmul).
    wc_row = b_at(8, H)                                        # (1, H)
    bc = b_ref[9:10, 0:1]                                      # (1, 1)
    scores = jnp.sum(g * wc_row, axis=-1, keepdims=True) + bc  # (RN, 1) f32

    # --- per-graph softmax-weighted pooling ----------------------------------
    # Softmax stabilizer: any constant that is uniform within a graph cancels
    # exactly, so a single chunk-global max is mathematically identical to the
    # per-graph max; scores are tanh*sigmoid gated (tightly bounded), so exp()
    # cannot underflow a whole graph.  O(1) ops regardless of GC (no unrolled
    # per-graph sublane slicing).
    e = jnp.exp(scores - jnp.max(scores, keepdims=True))       # (RN, 1) f32

    # Segment matrix (compile-time pattern, built in-register; it could also be
    # baked into the weight slab): seg[b, i] = node i belongs to graph b.
    col = jax.lax.broadcasted_iota(jnp.int32, (GC, RN), 1)
    row = jax.lax.broadcasted_iota(jnp.int32, (GC, RN), 0)
    seg = ((col >= row * N) & (col < (row + 1) * N)).astype(bf16)   # (GC, RN)

    # pooled[b] = (sum_i e_i * x3_i) / (sum_i e_i): both sums in ONE explicit
    # bf16 x bf16 MXU pass with f32 accumulation (single pass on v5e/v6e/v7x).
    num_den = jnp.dot(seg, jnp.concatenate([e * x3, e], axis=-1).astype(bf16),
                      preferred_element_type=f32)              # (GC, H + 1)
    pooled = num_den[:, :H] * pl.reciprocal(num_den[:, H:H + 1], approx=False)  # (GC, H)

    # --- path_rho (Linear -> ReLU) + classifier (padded to 128 lanes) --------
    hp = jnp.maximum(lin(pooled, w_at(R_WR, H, H), b_at(7, H)), 0.0)   # (GC, H)
    logits = lin(hp, w_at(R_WOUT, H, OUT_LANES), b_ref[10:11, :])      # (GC, 128)
    out_ref[...] = logits                                      # single lane-dense store


# --------------------------- wrapper-side glue ------------------------------

def init_params(key):
    shapes = dict(
        w1a=(F, H), b1a=(H,), w1b=(H, H), b1b=(H,),
        w2a=(H, H), b2a=(H,), w2b=(H, H), b2b=(H,),
        w3a=(H, H), b3a=(H,), w3b=(H, H), b3b=(H,),
        wa=(H, H), ba=(H,), wb=(H, H), bb=(H,),
        wc=(H, 1), bc=(1,),
        wr=(H, H), br=(H,),
        wcl=(H, C), bcl=(C,),
    )
    keys = jax.random.split(key, len(shapes))
    return {name: 0.1 * jax.random.normal(k, shp, jnp.float32)
            for (name, shp), k in zip(shapes.items(), keys)}


def pack_params(p):
    """Pack the 22 tensors into ONE bf16 weight slab + ONE f32 bias slab (few DMAs)."""
    w = jnp.zeros((W_ROWS, OUT_LANES), jnp.float32)
    w = w.at[R_W1A:R_W1A + F, :H].set(p["w1a"])
    w = w.at[R_W1B:R_W1B + H, :H].set(p["w1b"])
    w = w.at[R_W2A:R_W2A + H, :H].set(p["w2a"])
    w = w.at[R_W2B:R_W2B + H, :H].set(p["w2b"])
    w = w.at[R_W3A:R_W3A + H, :H].set(p["w3a"])
    w = w.at[R_W3B:R_W3B + H, :H].set(p["w3b"])
    w = w.at[R_WR:R_WR + H, :H].set(p["wr"])
    w = w.at[R_WAB:R_WAB + H, :2 * H].set(jnp.concatenate([p["wa"], p["wb"]], axis=1))
    w = w.at[R_WOUT:R_WOUT + H, :C].set(p["wcl"])
    w_slab = w.astype(jnp.bfloat16)                       # (320, 128) bf16

    b = jnp.zeros((B_ROWS, OUT_LANES), jnp.float32)       # (16, 128) f32
    b = b.at[0, :H].set(p["b1a"])
    b = b.at[1, :H].set(p["b1b"])
    b = b.at[2, :H].set(p["b2a"])
    b = b.at[3, :H].set(p["b2b"])
    b = b.at[4, :H].set(p["b3a"])
    b = b.at[5, :H].set(p["b3b"])
    b = b.at[6, :2 * H].set(jnp.concatenate([p["ba"], p["bb"]]))
    b = b.at[7, :H].set(p["br"])
    b = b.at[8, :H].set(p["wc"][:, 0])     # attention_c weight as a row (VPU score)
    b = b.at[9, 0].set(p["bc"][0])
    b = b.at[10, :C].set(p["bcl"])
    return w_slab, b


def knn_adjacency(pos, k):
    # adj[i, j] = 1 iff j is among the k nearest neighbors of i (self excluded).
    # TODO(synk): argsort tie-breaking may differ from torch_geometric.knn_graph.
    n = pos.shape[0]
    d2 = jnp.sum((pos[:, None, :] - pos[None, :, :]) ** 2, axis=-1)
    d2 = d2 + jnp.eye(n, dtype=d2.dtype) * 1e10
    idx = jnp.argsort(d2, axis=-1)[:, :k]
    return jax.nn.one_hot(idx, n, dtype=jnp.float32).sum(axis=1)


def dgcn_forward(x, adj, params):
    """x: (B_TOTAL, N, F) node features, adj: (B_TOTAL, N, N) per-graph kNN adjacency."""
    w_slab, b_slab = pack_params(params)

    # Flatten graphs to rows; chunk c owns rows [c*RN, (c+1)*RN).
    x_flat = x.reshape(B_TOTAL * N, F).astype(jnp.bfloat16)

    # Per-chunk block-diagonal adjacency with the GIN self term (I) folded in.
    eye = jnp.eye(N, dtype=jnp.float32)
    adj_bd = jnp.zeros((NUM_CHUNKS * RN, RN), jnp.float32)
    for c in range(NUM_CHUNKS):
        for g in range(GC):
            r0, c0 = c * RN + g * N, g * N
            adj_bd = adj_bd.at[r0:r0 + N, c0:c0 + N].set(adj[c * GC + g] + eye)
    adj_bd = adj_bd.astype(jnp.bfloat16)

    logits_pad = pl.pallas_call(
        _dgcn_kernel,
        out_shape=jax.ShapeDtypeStruct((B_TOTAL, OUT_LANES), jnp.float32),
        grid=(NUM_CHUNKS,),
        in_specs=[
            pl.BlockSpec((RN, F), lambda i: (i, 0)),               # node features (chunk)
            pl.BlockSpec((RN, RN), lambda i: (i, 0)),              # chunk block-diag adjacency
            pl.BlockSpec((W_ROWS, OUT_LANES), lambda i: (0, 0)),   # packed bf16 weights
            pl.BlockSpec((B_ROWS, OUT_LANES), lambda i: (0, 0)),   # packed f32 biases
        ],
        out_specs=pl.BlockSpec((GC, OUT_LANES), lambda i: (i, 0)),
        compiler_params=pltpu.CompilerParams(
            dimension_semantics=("parallel",)),                    # both v7x TensorCores
    )(x_flat, adj_bd, w_slab, b_slab)
    return logits_pad[:, :C]


def reference_forward(x, adj, p):
    """Pure-JAX f32 reference of the same forward pass (for a sanity check)."""
    def gin(h, wA, bA, wB, bB):
        agg = jnp.einsum("bij,bjf->bif", adj, h) + h
        z = jnp.maximum(agg @ wA + bA, 0.0)
        return jnp.maximum(z @ wB + bB, 0.0)
    x1 = gin(x, p["w1a"], p["b1a"], p["w1b"], p["b1b"])
    x2 = gin(x1, p["w2a"], p["b2a"], p["w2b"], p["b2b"])
    x3 = gin(x2, p["w3a"], p["b3a"], p["w3b"], p["b3b"])
    a = jnp.tanh(x3 @ p["wa"] + p["ba"])
    b = jax.nn.sigmoid(x3 @ p["wb"] + p["bb"])
    s = (a * b) @ p["wc"] + p["bc"]
    s = s - jnp.max(s, axis=1, keepdims=True)
    e = jnp.exp(s)
    gate = e / jnp.sum(e, axis=1, keepdims=True)
    pooled = jnp.sum(gate * x3, axis=1)
    hp = jnp.maximum(pooled @ p["wr"] + p["br"], 0.0)
    return hp @ p["wcl"] + p["bcl"]


if __name__ == "__main__":
    key = jax.random.PRNGKey(0)
    k_feat, k_pos, k_w = jax.random.split(key, 3)

    # Per-graph node features and tile coordinates.
    x = jax.random.normal(k_feat, (B_TOTAL, N, F), jnp.float32)
    tiles = 10.0 * jax.random.normal(k_pos, (B_TOTAL, N, 2), jnp.float32)

    # KNNGraph / Batch: dense kNN adjacency per graph (plain-JAX host glue).
    # TODO(synk): PyG's Batch supports variable-size graphs; here all graphs share N.
    adj = jax.vmap(lambda p: knn_adjacency(p, KNN))(tiles)   # (B_TOTAL, N, N)

    params = init_params(k_w)
    logits = dgcn_forward(x, adj, params)
    jax.block_until_ready(logits)

    ref = reference_forward(x, adj, params)
    assert logits.shape == (B_TOTAL, C)
    assert bool(jnp.all(jnp.isfinite(logits)))
    # bf16 matmuls -> allow a loose tolerance against the f32 reference.
    assert bool(jnp.allclose(logits, ref, atol=1e-1, rtol=2e-1))
    print("KERNEL_OK")
</pallas_src>

<mosaic_0001>
module attributes {stable_mosaic.version = 11 : i64} {
  func.func @_dgcn_kernel(%arg0: i32, %arg1: memref<128x64xbf16, #tpu.memory_space<vmem>>, %arg2: memref<128x128xbf16, #tpu.memory_space<vmem>>, %arg3: memref<320x128xbf16, #tpu.memory_space<vmem>>, %arg4: memref<16x128xf32, #tpu.memory_space<vmem>>, %arg5: memref<8x128xf32, #tpu.memory_space<vmem>>) attributes {dimension_semantics = [#tpu.dimension_semantics<parallel>], iteration_bounds = array<i64: 2>, scalar_prefetch = 0 : i64, scratch_operands = 0 : i64, tpu.core_type = #tpu.core_type<tc>, window_params = [{transform_indices = @transform_0, window_bounds = array<i64: 128, 64>}, {transform_indices = @transform_1, window_bounds = array<i64: 128, 128>}, {pipeline_mode = #tpu.pipeline_mode<synchronous>, transform_indices = @transform_2, window_bounds = array<i64: 320, 128>}, {pipeline_mode = #tpu.pipeline_mode<synchronous>, transform_indices = @transform_3, window_bounds = array<i64: 16, 128>}, {transform_indices = @transform_4, window_bounds = array<i64: 8, 128>}]} {
    %c0 = arith.constant 0 : index
    %c0_0 = arith.constant 0 : index
    %0 = vector.load %arg1[%c0, %c0_0] : memref<128x64xbf16, #tpu.memory_space<vmem>>, vector<128x64xbf16>
    %c0_1 = arith.constant 0 : index
    %c0_2 = arith.constant 0 : index
    %1 = vector.load %arg2[%c0_1, %c0_2] : memref<128x128xbf16, #tpu.memory_space<vmem>>, vector<128x128xbf16>
    %c0_3 = arith.constant 0 : index
    %c0_4 = arith.constant 0 : index
    %2 = vector.load %arg3[%c0_3, %c0_4] : memref<320x128xbf16, #tpu.memory_space<vmem>>, vector<64x32xbf16>
    %c0_5 = arith.constant 0 : index
    %c0_6 = arith.constant 0 : index
    %3 = vector.load %arg4[%c0_5, %c0_6] : memref<16x128xf32, #tpu.memory_space<vmem>>, vector<1x32xf32>
    %c64 = arith.constant 64 : index
    %c0_7 = arith.constant 0 : index
    %4 = vector.load %arg3[%c64, %c0_7] : memref<320x128xbf16, #tpu.memory_space<vmem>>, vector<32x32xbf16>
    %c1 = arith.constant 1 : index
    %c0_8 = arith.constant 0 : index
    %5 = vector.load %arg4[%c1, %c0_8] : memref<16x128xf32, #tpu.memory_space<vmem>>, vector<1x32xf32>
    %cst = arith.constant dense<0.000000e+00> : vector<128x64xf32>
    %6 = tpu.matmul %1, %0, %cst {dimension_numbers = #tpu.dot_dimension_numbers<[1], [0], [0], [1], [0, 0, 1, 1], [], []>} : vector<128x128xbf16>, vector<128x64xbf16>, vector<128x64xf32> -> vector<128x64xf32>
    %7 = arith.truncf %6 : vector<128x64xf32> to vector<128x64xbf16>
    %cst_9 = arith.constant dense<0.000000e+00> : vector<128x32xf32>
    %8 = tpu.matmul %7, %2, %cst_9 {dimension_numbers = #tpu.dot_dimension_numbers<[1], [0], [0], [1], [0, 0, 1, 1], [], []>} : vector<128x64xbf16>, vector<64x32xbf16>, vector<128x32xf32> -> vector<128x32xf32>
    %9 = vector.broadcast %3 : vector<1x32xf32> to vector<128x32xf32>
    %10 = arith.addf %8, %9 : vector<128x32xf32>
    %cst_10 = arith.constant 0.000000e+00 : f32
    %11 = vector.broadcast %cst_10 : f32 to vector<128x32xf32>
    %12 = arith.maximumf %10, %11 : vector<128x32xf32>
    %13 = arith.truncf %12 : vector<128x32xf32> to vector<128x32xbf16>
    %cst_11 = arith.constant dense<0.000000e+00> : vector<128x32xf32>
    %14 = tpu.matmul %13, %4, %cst_11 {dimension_numbers = #tpu.dot_dimension_numbers<[1], [0], [0], [1], [0, 0, 1, 1], [], []>} : vector<128x32xbf16>, vector<32x32xbf16>, vector<128x32xf32> -> vector<128x32xf32>
    %15 = vector.broadcast %5 : vector<1x32xf32> to vector<128x32xf32>
    %16 = arith.addf %14, %15 : vector<128x32xf32>
    %cst_12 = arith.constant 0.000000e+00 : f32
    %17 = vector.broadcast %cst_12 : f32 to vector<128x32xf32>
    %18 = arith.maximumf %16, %17 : vector<128x32xf32>
    %c96 = arith.constant 96 : index
    %c0_13 = arith.constant 0 : index
    %19 = vector.load %arg3[%c96, %c0_13] : memref<320x128xbf16, #tpu.memory_space<vmem>>, vector<32x32xbf16>
    %c2 = arith.constant 2 : index
    %c0_14 = arith.constant 0 : index
    %20 = vector.load %arg4[%c2, %c0_14] : memref<16x128xf32, #tpu.memory_space<vmem>>, vector<1x32xf32>
    %c128 = arith.constant 128 : index
    %c0_15 = arith.constant 0 : index
    %21 = vector.load %arg3[%c128, %c0_15] : memref<320x128xbf16, #tpu.memory_space<vmem>>, vector<32x32xbf16>
    %c3 = arith.constant 3 : index
    %c0_16 = arith.constant 0 : index
    %22 = vector.load %arg4[%c3, %c0_16] : memref<16x128xf32, #tpu.memory_space<vmem>>, vector<1x32xf32>
    %23 = arith.truncf %18 : vector<128x32xf32> to vector<128x32xbf16>
    %cst_17 = arith.constant dense<0.000000e+00> : vector<128x32xf32>
    %24 = tpu.matmul %1, %23, %cst_17 {dimension_numbers = #tpu.dot_dimension_numbers<[1], [0], [0], [1], [0, 0, 1, 1], [], []>} : vector<128x128xbf16>, vector<128x32xbf16>, vector<128x32xf32> -> vector<128x32xf32>
    %25 = arith.truncf %24 : vector<128x32xf32> to vector<128x32xbf16>
    %cst_18 = arith.constant dense<0.000000e+00> : vector<128x32xf32>
    %26 = tpu.matmul %25, %19, %cst_18 {dimension_numbers = #tpu.dot_dimension_numbers<[1], [0], [0], [1], [0, 0, 1, 1], [], []>} : vector<128x32xbf16>, vector<32x32xbf16>, vector<128x32xf32> -> vector<128x32xf32>
    %27 = vector.broadcast %20 : vector<1x32xf32> to vector<128x32xf32>
    %28 = arith.addf %26, %27 : vector<128x32xf32>
    %cst_19 = arith.constant 0.000000e+00 : f32
    %29 = vector.broadcast %cst_19 : f32 to vector<128x32xf32>
    %30 = arith.maximumf %28, %29 : vector<128x32xf32>
    %31 = arith.truncf %30 : vector<128x32xf32> to vector<128x32xbf16>
    %cst_20 = arith.constant dense<0.000000e+00> : vector<128x32xf32>
    %32 = tpu.matmul %31, %21, %cst_20 {dimension_numbers = #tpu.dot_dimension_numbers<[1], [0], [0], [1], [0, 0, 1, 1], [], []>} : vector<128x32xbf16>, vector<32x32xbf16>, vector<128x32xf32> -> vector<128x32xf32>
    %33 = vector.broadcast %22 : vector<1x32xf32> to vector<128x32xf32>
    %34 = arith.addf %32, %33 : vector<128x32xf32>
    %cst_21 = arith.constant 0.000000e+00 : f32
    %35 = vector.broadcast %cst_21 : f32 to vector<128x32xf32>
    %36 = arith.maximumf %34, %35 : vector<128x32xf32>
    %c160 = arith.constant 160 : index
    %c0_22 = arith.constant 0 : index
    %37 = vector.load %arg3[%c160, %c0_22] : memref<320x128xbf16, #tpu.memory_space<vmem>>, vector<32x32xbf16>
    %c4 = arith.constant 4 : index
    %c0_23 = arith.constant 0 : index
    %38 = vector.load %arg4[%c4, %c0_23] : memref<16x128xf32, #tpu.memory_space<vmem>>, vector<1x32xf32>
    %c192 = arith.constant 192 : index
    %c0_24 = arith.constant 0 : index
    %39 = vector.load %arg3[%c192, %c0_24] : memref<320x128xbf16, #tpu.memory_space<vmem>>, vector<32x32xbf16>
    %c5 = arith.constant 5 : index
    %c0_25 = arith.constant 0 : index
    %40 = vector.load %arg4[%c5, %c0_25] : memref<16x128xf32, #tpu.memory_space<vmem>>, vector<1x32xf32>
    %41 = arith.truncf %36 : vector<128x32xf32> to vector<128x32xbf16>
    %cst_26 = arith.constant dense<0.000000e+00> : vector<128x32xf32>
    %42 = tpu.matmul %1, %41, %cst_26 {dimension_numbers = #tpu.dot_dimension_numbers<[1], [0], [0], [1], [0, 0, 1, 1], [], []>} : vector<128x128xbf16>, vector<128x32xbf16>, vector<128x32xf32> -> vector<128x32xf32>
    %43 = arith.truncf %42 : vector<128x32xf32> to vector<128x32xbf16>
    %cst_27 = arith.constant dense<0.000000e+00> : vector<128x32xf32>
    %44 = tpu.matmul %43, %37, %cst_27 {dimension_numbers = #tpu.dot_dimension_numbers<[1], [0], [0], [1], [0, 0, 1, 1], [], []>} : vector<128x32xbf16>, vector<32x32xbf16>, vector<128x32xf32> -> vector<128x32xf32>
    %45 = vector.broadcast %38 : vector<1x32xf32> to vector<128x32xf32>
    %46 = arith.addf %44, %45 : vector<128x32xf32>
    %cst_28 = arith.constant 0.000000e+00 : f32
    %47 = vector.broadcast %cst_28 : f32 to vector<128x32xf32>
    %48 = arith.maximumf %46, %47 : vector<128x32xf32>
    %49 = arith.truncf %48 : vector<128x32xf32> to vector<128x32xbf16>
    %cst_29 = arith.constant dense<0.000000e+00> : vector<128x32xf32>
    %50 = tpu.matmul %49, %39, %cst_29 {dimension_numbers = #tpu.dot_dimension_numbers<[1], [0], [0], [1], [0, 0, 1, 1], [], []>} : vector<128x32xbf16>, vector<32x32xbf16>, vector<128x32xf32> -> vector<128x32xf32>
    %51 = vector.broadcast %40 : vector<1x32xf32> to vector<128x32xf32>
    %52 = arith.addf %50, %51 : vector<128x32xf32>
    %cst_30 = arith.constant 0.000000e+00 : f32
    %53 = vector.broadcast %cst_30 : f32 to vector<128x32xf32>
    %54 = arith.maximumf %52, %53 : vector<128x32xf32>
    %c256 = arith.constant 256 : index
    %c0_31 = arith.constant 0 : index
    %55 = vector.load %arg3[%c256, %c0_31] : memref<320x128xbf16, #tpu.memory_space<vmem>>, vector<32x64xbf16>
    %c6 = arith.constant 6 : index
    %c0_32 = arith.constant 0 : index
    %56 = vector.load %arg4[%c6, %c0_32] : memref<16x128xf32, #tpu.memory_space<vmem>>, vector<1x64xf32>
    %57 = arith.truncf %54 : vector<128x32xf32> to vector<128x32xbf16>
    %cst_33 = arith.constant dense<0.000000e+00> : vector<128x64xf32>
    %58 = tpu.matmul %57, %55, %cst_33 {dimension_numbers = #tpu.dot_dimension_numbers<[1], [0], [0], [1], [0, 0, 1, 1], [], []>} : vector<128x32xbf16>, vector<32x64xbf16>, vector<128x64xf32> -> vector<128x64xf32>
    %59 = vector.broadcast %56 : vector<1x64xf32> to vector<128x64xf32>
    %60 = arith.addf %58, %59 : vector<128x64xf32>
    %61 = vector.extract_strided_slice %60 {offsets = [0, 0], sizes = [128, 32], strides = [1, 1]} : vector<128x64xf32> to vector<128x32xf32>
    %62 = math.tanh %61 : vector<128x32xf32>
    %63 = vector.extract_strided_slice %60 {offsets = [0, 32], sizes = [128, 32], strides = [1, 1]} : vector<128x64xf32> to vector<128x32xf32>
    %64 = arith.negf %63 : vector<128x32xf32>
    %65 = math.exp %64 : vector<128x32xf32>
    %cst_34 = arith.constant 1.000000e+00 : f32
    %66 = vector.broadcast %cst_34 : f32 to vector<128x32xf32>
    %67 = arith.addf %66, %65 : vector<128x32xf32>
    %68 = arith.divf %66, %67 : vector<128x32xf32>
    %69 = arith.mulf %62, %68 : vector<128x32xf32>
    %c8 = arith.constant 8 : index
    %c0_35 = arith.constant 0 : index
    %70 = vector.load %arg4[%c8, %c0_35] : memref<16x128xf32, #tpu.memory_space<vmem>>, vector<1x32xf32>
    %c9 = arith.constant 9 : index
    %c0_36 = arith.constant 0 : index
    %71 = vector.load %arg4[%c9, %c0_36] : memref<16x128xf32, #tpu.memory_space<vmem>>, vector<1x1xf32>
    %72 = vector.broadcast %70 : vector<1x32xf32> to vector<128x32xf32>
    %73 = arith.mulf %69, %72 : vector<128x32xf32>
    %cst_37 = arith.constant dense<0.000000e+00> : vector<128xf32>
    %74 = vector.multi_reduction <add>, %73, %cst_37 [1] : vector<128x32xf32> to vector<128xf32>
    %75 = vector.shape_cast %74 : vector<128xf32> to vector<128x1xf32>
    %76 = vector.broadcast %71 : vector<1x1xf32> to vector<128x1xf32>
    %77 = arith.addf %75, %76 : vector<128x1xf32>
    %78 = vector.shape_cast %77 : vector<128x1xf32> to vector<1x128x1xf32>
    %cst_38 = arith.constant dense<0xFF800000> : vector<1xf32>
    %79 = vector.multi_reduction <maximumf>, %78, %cst_38 [1, 2] : vector<1x128x1xf32> to vector<1xf32>
    %80 = vector.shape_cast %79 : vector<1xf32> to vector<1x1x1xf32>
    %81 = vector.extract %80[0, 0, 0] : f32 from vector<1x1x1xf32>
    %82 = vector.broadcast %81 : f32 to vector<1x1xf32>
    %83 = vector.broadcast %82 : vector<1x1xf32> to vector<128x1xf32>
    %84 = arith.subf %77, %83 : vector<128x1xf32>
    %85 = math.exp %84 : vector<128x1xf32>
    %86 = tpu.iota {dimensions = array<i32: 1>} : vector<8x128xi32>
    %87 = tpu.iota {dimensions = array<i32: 0>} : vector<8x128xi32>
    %c16_i32 = arith.constant 16 : i32
    %88 = vector.broadcast %c16_i32 : i32 to vector<8x128xi32>
    %89 = arith.muli %87, %88 : vector<8x128xi32>
    %90 = arith.cmpi sge, %86, %89 : vector<8x128xi32>
    %c1_i32 = arith.constant 1 : i32
    %91 = vector.broadcast %c1_i32 : i32 to vector<8x128xi32>
    %92 = arith.addi %87, %91 : vector<8x128xi32>
    %c16_i32_39 = arith.constant 16 : i32
    %93 = vector.broadcast %c16_i32_39 : i32 to vector<8x128xi32>
    %94 = arith.muli %92, %93 : vector<8x128xi32>
    %95 = arith.cmpi slt, %86, %94 : vector<8x128xi32>
    %96 = arith.andi %90, %95 : vector<8x128xi1>
    %97 = arith.extui %96 : vector<8x128xi1> to vector<8x128xi32>
    %98 = arith.sitofp %97 : vector<8x128xi32> to vector<8x128xf32>
    %99 = arith.truncf %98 : vector<8x128xf32> to vector<8x128xbf16>
    %100 = vector.broadcast %85 : vector<128x1xf32> to vector<128x32xf32>
    %101 = arith.mulf %100, %54 : vector<128x32xf32>
    %102 = tpu.concatenate %101, %85 in 1 : vector<128x32xf32>, vector<128x1xf32> -> vector<128x33xf32>
    %103 = arith.truncf %102 : vector<128x33xf32> to vector<128x33xbf16>
    %cst_40 = arith.constant dense<0.000000e+00> : vector<8x33xf32>
    %104 = tpu.matmul %99, %103, %cst_40 {dimension_numbers = #tpu.dot_dimension_numbers<[1], [0], [0], [1], [0, 0, 1, 1], [], []>} : vector<8x128xbf16>, vector<128x33xbf16>, vector<8x33xf32> -> vector<8x33xf32>
    %105 = vector.extract_strided_slice %104 {offsets = [0, 0], sizes = [8, 32], strides = [1, 1]} : vector<8x33xf32> to vector<8x32xf32>
    %106 = vector.extract_strided_slice %104 {offsets = [0, 32], sizes = [8, 1], strides = [1, 1]} : vector<8x33xf32> to vector<8x1xf32>
    %107 = tpu.reciprocal %106 : vector<8x1xf32> -> vector<8x1xf32>
    %108 = vector.broadcast %107 : vector<8x1xf32> to vector<8x32xf32>
    %109 = arith.mulf %105, %108 : vector<8x32xf32>
    %c224 = arith.constant 224 : index
    %c0_41 = arith.constant 0 : index
    %110 = vector.load %arg3[%c224, %c0_41] : memref<320x128xbf16, #tpu.memory_space<vmem>>, vector<32x32xbf16>
    %c7 = arith.constant 7 : index
    %c0_42 = arith.constant 0 : index
    %111 = vector.load %arg4[%c7, %c0_42] : memref<16x128xf32, #tpu.memory_space<vmem>>, vector<1x32xf32>
    %112 = arith.truncf %109 : vector<8x32xf32> to vector<8x32xbf16>
    %cst_43 = arith.constant dense<0.000000e+00> : vector<8x32xf32>
    %113 = tpu.matmul %112, %110, %cst_43 {dimension_numbers = #tpu.dot_dimension_numbers<[1], [0], [0], [1], [0, 0, 1, 1], [], []>} : vector<8x32xbf16>, vector<32x32xbf16>, vector<8x32xf32> -> vector<8x32xf32>
    %114 = vector.broadcast %111 : vector<1x32xf32> to vector<8x32xf32>
    %115 = arith.addf %113, %114 : vector<8x32xf32>
    %cst_44 = arith.constant 0.000000e+00 : f32
    %116 = vector.broadcast %cst_44 : f32 to vector<8x32xf32>
    %117 = arith.maximumf %115, %116 : vector<8x32xf32>
    %c288 = arith.constant 288 : index
    %c0_45 = arith.constant 0 : index
    %118 = vector.load %arg3[%c288, %c0_45] : memref<320x128xbf16, #tpu.memory_space<vmem>>, vector<32x128xbf16>
    %c10 = arith.constant 10 : index
    %c0_46 = arith.constant 0 : index
    %119 = vector.load %arg4[%c10, %c0_46] : memref<16x128xf32, #tpu.memory_space<vmem>>, vector<1x128xf32>
    %120 = arith.truncf %117 : vector<8x32xf32> to vector<8x32xbf16>
    %cst_47 = arith.constant dense<0.000000e+00> : vector<8x128xf32>
    %121 = tpu.matmul %120, %118, %cst_47 {dimension_numbers = #tpu.dot_dimension_numbers<[1], [0], [0], [1], [0, 0, 1, 1], [], []>} : vector<8x32xbf16>, vector<32x128xbf16>, vector<8x128xf32> -> vector<8x128xf32>
    %122 = vector.broadcast %119 : vector<1x128xf32> to vector<8x128xf32>
    %123 = arith.addf %121, %122 : vector<8x128xf32>
    %c0_48 = arith.constant 0 : index
    %c0_49 = arith.constant 0 : index
    %124 = vector.load %arg5[%c0_48, %c0_49] : memref<8x128xf32, #tpu.memory_space<vmem>>, vector<8x128xf32>
    tpu.vector_store %arg5[%c0_48, %c0_49], %123 {strides = array<i32>} : memref<8x128xf32, #tpu.memory_space<vmem>>, vector<8x128xf32>,
    return
  }
  func.func @transform_0(%arg0: i32) -> (i32, i32) {
    %c0_i32 = arith.constant 0 : i32
    %c0_i32_0 = arith.constant 0 : i32
    return %arg0, %c0_i32 : i32, i32
  }
  func.func @transform_1(%arg0: i32) -> (i32, i32) {
    %c0_i32 = arith.constant 0 : i32
    %c0_i32_0 = arith.constant 0 : i32
    return %arg0, %c0_i32 : i32, i32
  }
  func.func @transform_2(%arg0: i32) -> (i32, i32) {
    %c0_i32 = arith.constant 0 : i32
    %c0_i32_0 = arith.constant 0 : i32
    %c0_i32_1 = arith.constant 0 : i32
    return %c0_i32, %c0_i32_0 : i32, i32
  }
  func.func @transform_3(%arg0: i32) -> (i32, i32) {
    %c0_i32 = arith.constant 0 : i32
    %c0_i32_0 = arith.constant 0 : i32
    %c0_i32_1 = arith.constant 0 : i32
    return %c0_i32, %c0_i32_0 : i32, i32
  }
  func.func @transform_4(%arg0: i32) -> (i32, i32) {
    %c0_i32 = arith.constant 0 : i32
    %c0_i32_0 = arith.constant 0 : i32
    return %arg0, %c0_i32 : i32, i32
  }
}

</mosaic_0001>

<bundles_post_ra>
// kernel: tpu_custom_call.1
= control target key start
LH: loop header
LB: loop body
LE: loop exit
PB: predicated region body
PF: predicated region fallthrough
CT: control target
= control target key end

     0   :  { %9 = vsyncpa [#allocation3], 0  ;;  %s4341_s0 = inlined_call_operand.vmem [shape: bf16[256,64], index: 0, kind: input, shape index: {}]   ;;  %s4342_s1 = inlined_call_operand.hbm [shape: bf16[256,128], index: 1, kind: input, shape index: {}]   ;;  %s4343_s2 = inlined_call_operand.vmem [shape: bf16[320,128], index: 2, kind: input, shape index: {}]   ;;  %s4344_s3 = inlined_call_operand.vmem [shape: f32[16,128], index: 3, kind: input, shape index: {}]   ;;  %s4345_s4 = inlined_call_operand.hbm [shape: f32[16,128], index: 4, kind: output, shape index: {}]  }
   0x1   :  { %11 = vsyncpa [#allocation3 + $0x1], 0 }
   0x2   :  { %12 = vsyncpa [#allocation4], 0 }
   0x3   :  { %14 = vsyncpa [#allocation4 + $0x1], 0  ;;  %s3615_s15 = smov 0   ;;  %s3617_s16 = smov 0  }
   0x4   :  { %s3619_s17 = smov 0   ;;  %s3621_s18 = smov 0  }
   0x5 LB: > { %s3636_s19 = sadd.s32 4294967295, %s3577_s18   ;;  %s2667_s20 = sadd.s32 4294967294, %s3577_s18   ;;  %s3577_s18 = sphi %s3621_s18, %s4386_s18   ;;  %s3573_s17 = sphi %s3619_s17, %s4385_s17   ;;  %s3569_s16 = sphi %s3617_s16, %s4384_s16   ;;  %s3565_s15 = sphi %s3615_s15, %s4383_s15  }
   0x6   : > { %s3640_s21 = sadd.s32 1, %s3577_s18   ;;  %s53_s22 = sadd.s32 1, %s3573_s17 }
   0x7   : > { %s50_s23 = ssub.s32 %s3577_s18, %s3640_s21  ;;  %p60_p0 = scmp.ne.s32.totalorder %s3573_s17, %s3569_s16 }
   0x8   : > { %p51_p1 = scmp.eq.s32.totalorder %s50_s23, 0  ;;  %p61_p2 = scmp.eq.s32.totalorder %s3577_s18, 0 }
   0x9   : > { %p66_p3 = scmp.ne.s32.totalorder %s3569_s16, %s3565_s15  ;;  %p67_p4 = scmp.eq.s32.totalorder %s3636_s19, 0 }
   0xa   : > { %s3652_s24 = scalar_select %p51_p1, %s3573_s17, %s53_s22  }
   0xb   : > { %p3654_p5 = por %p61_p2, %p60_p0  ;;  %p3658_p6 = por %p67_p4, %p66_p3 }
   0xc   : > { %p132_p7 = scmp.eq.s32.totalorder %s3636_s19, 1  ;;  %p138_p8 = scmp.eq.s32.totalorder %s2667_s20, 1 }
   0xd   : > { %s4362_s26 = scalar_select %p3658_p6, 1, 0 }
   0xe   : > { %p3232_p10 = scmp.lt.s32.totalorder %s3577_s18, 2  ;;  %p3665_p11 = por %p132_p7, %p60_p0 }
   0xf   : > { %p3669_p12 = por %p138_p8, %p66_p3  ;;  %s173_s29 = sand.u32 1, %s3573_s17  }
  0x10   : > { %s4363_s27 = scalar_select %p3665_p11, 1, 0 }
  0x11   : > { %s4364_s28 = scalar_select %p3669_p12, 1, 0 }
  0x12   : > { %s2806_s30 = sshll.u32 %s3577_s18, 10  ;;  %s2670_s5 = sshll.u32 %s173_s29, 6 }
  0x13   : > { %s3678_s8 = scalar_lea.hbm %s4342_s1, %s2806_s30  ;;  %s177_s9 = scalar_lea.vmem [#allocation2], %s2670_s5 }
  0x14   : > { %s184_s10 = sshll.u32 %s177_s9, 4  ;;  %p3682_p13 = pnand %p3232_p10, %p3654_p5  ;;  %s3686_s10 = int_to_ptr.vmem [resolvable:$true] %s184_s10 }
  0x15   : > { %s3688_s12 = scalar_lea.sflag [#allocation3], %s173_s29  ;;  %s3485_s13 = scalar_lea.hbm %s3678_s8, 1024 }
  0x16   : > { %p3486_p0 = scmp.ne.s32.totalorder %s3678_s8, %s3485_s13  ;;  %p3487_p1 = pneg %p3682_p13 }
  0x17   : > { %s3490_s22 = scalar_lea.hbm %s4342_s1, 2048  ;;  %p3491_p4 = scmp.lt.s32.totalorder %s3678_s8, %s4342_s1 }
  0x18   : > { %p3488_p2 = pnand %p3487_p1, %p3486_p0  ;;  %p3492_p5 = scmp.lt.s32.totalorder %s3490_s22, %s3485_s13 }
  0x1a   : > { %p3489_p3 = pneg %p3488_p2  ;;  %p3493_p7 = por %p3492_p5, %p3491_p4 }
  0x1c   : > { %p3494_p8 = pnand %p3493_p7, %p3489_p3 }
  0x1e   : > { %3497 = shalt.err (!%p3494_p8)
}
  0x1f   : > { %s3498_s29 = scalar_lea.vmem %s3686_s10, 1024  ;;  %s3579_s30 = smov [#allocation2]  }
  0x20   : > { %p3499_p10 = scmp.ne.s32.totalorder %s3686_s10, %s3498_s29  ;;  %s3503_s5 = sshll.u32 %s3579_s30, 4  ;;  %s3504_s5 = int_to_ptr.vmem [resolvable:$false] %s3503_s5 }
  0x21   : > { %s3505_s6 = scalar_lea.vmem %s3504_s5, 2048  ;;  %p3506_p2 = scmp.lt.s32.totalorder %s3686_s10, %s3504_s5 }
  0x22   : > { %p3501_p9 = pnand %p3499_p10, %p3487_p1  ;;  %p3507_p12 = scmp.lt.s32.totalorder %s3505_s6, %s3498_s29 }
  0x24   : > { %p3502_p0 = pneg %p3501_p9  ;;  %p3508_p11 = por %p3507_p12, %p3506_p2 }
  0x26   : > { %p3509_p6 = pnand %p3508_p11, %p3502_p0 }
  0x28   : > { %3512 = shalt.err (!%p3509_p6)
}
  0x29   : > { %s3580_s7 = smov 64   ;;  %s3581_s9 = smov 4  }
  0x2a   : > { %3227 = dma.hbm_to_vmem [thread:$0]  (!%p3682_p13), %s3678_s8, 1024, %s3686_s10, %s3688_s12, %s3580_s7, %s3580_s7, %s3581_s9  }
  0x2b   : > { %p2673_p9 = scmp.ge.s32.totalorder %s3577_s18, 1  ;;  %p192_p1 = scmp.lt.s32.totalorder %s3577_s18, 3 }
  0x2d   : > { %p193_p3 = pnand %p2673_p9, %p192_p1 }
  0x2e   : > { %s3712_s13 = sand.u32 (!%p193_p3), 1, %s3569_s16   ;;  %p4366_p6 = scmp.ne.s32.totalorder (!%p193_p3), %s4362_s26, 0 }
  0x2f   : > { %196 = sbr.rel (%p193_p3) target bundleno = 3731 (0xe93), region = 36  ;;  %s2674_s14 = sshll.u32 (!%p193_p3), %s3712_s13, 6 }
  0x30   : > { %s199_s20 = scalar_lea.sflag (!%p193_p3), [#allocation3], %s3712_s13  ;;  %s3716_s22 = scalar_lea.vmem (!%p193_p3), [#allocation2], %s2674_s14 }
  0x34   : > { %3556 = dma.done.wait (%p4366_p6), %s199_s20, 1024  }
  0x35   : > { %3558 = vsyncadd (%p4366_p6), %s199_s20, 4294966272  ;;  %s2676_s8 = sshll.u32 %s3636_s19, 4  ;;  %v3727_v4 = vld [vmem:[%s3716_s22] sm:$0xff]   ;;  %v3335_v7 = vld [vmem:[%s4343_s2 + $0x18] sm:$0xff]   ;;  %vm515_vm0 = vcmask 523264   ;;  %vm677_vm1 = vcmask 261120  }
  0x36   : > { %p233_p11 = scmp.lt.s32.totalorder %s2676_s8, 31  ;;  %2958 = vmatprep.mubr.bf16.mxu0 %v3727_v4  ;;  %v3336_v8 = vld [vmem:[%s4343_s2 + $0x10] sm:$0xff]   ;;  %2974 = vmatprep.subr.bf16.mxu1 %v3335_v7  ;;  %v3737_v11 = vld [vmem:[%s3716_s22 + $0x8] sm:$0xff]   ;;  %v3745_v13 = vld [vmem:[%s3716_s22 + $0x18] sm:$0xff]   ;;  %s3582_s12 = smov 96   ;;  %vm2121_vm2 = vcmask 7168  }
  0x37   : > { %2975 = vmatpush3.bf16.msra.mxu1 %v3335_v7  ;;  %v3740_v12 = vld [vmem:[%s3716_s22 + $0x10] sm:$0xff]   ;;  %v3748_v14 = vld [vmem:[%s3716_s22 + $0x20] sm:$0xff]   ;;  %v3753_v15 = vld [vmem:[%s3716_s22 + $0x28] sm:$0xff]   ;;  %s3584_s5 = smov 32   ;;  %vm3586_vm3 = vmmov 0   ;;  %s2803_s29 = sshll.u32 %s3636_s19, 7 }
  0x38   : > { %s4388_s8 = smov (!%p233_p11, %s2676_s8), 31  ;;  %2976 = vmatprep.subr.bf16.mxu1 %v3336_v8  ;;  %v3756_v16 = vld [vmem:[%s3716_s22 + $0x30] sm:$0xff]   ;;  %v3761_v17 = vld [vmem:[%s3716_s22 + $0x38] sm:$0xff]   ;;  %v3337_v18 = vld [vmem:[%s4343_s2 + $0x8] sm:$0xff]   ;;  %s4298_s9 = scalar_lea.hbm %s4345_s4, %s2803_s29 }
  0x39   : > { %s2677_s10 = sshll.u32 %s4388_s8, 2  ;;  %v3338_v19 = vld [vmem:[%s4343_s2] sm:$0xff]   ;;  %v3339_v20 = vld [vmem:[%s4343_s2 + $0x28] sm:$0xff]   ;;  %s2572_s14 = scalar_lea.sflag [#allocation4], %s3712_s13 }
  0x3a   : > { %s236_s23 = scalar_lea.vmem %s4341_s0, %s2677_s10  ;;  %v3340_v28 = vld [vmem:[%s4343_s2 + $0x20] sm:$0xff]   ;;  %p4380_p13 = scmp.ne.s32.totalorder %s4363_s27, 0 }
  0x3b   : > { %v3319_v0 = vld [vmem:[%s236_s23 + $0x38] sm:$0xff]   ;;  %v3320_v1 = vld [vmem:[%s236_s23 + $0x30] sm:$0xff]   ;;  %v3321_v2 = vld [vmem:[%s236_s23 + $0x28] sm:$0xff]   ;;  %2977 = vmatpush3.bf16.msra.mxu1 %v3336_v8  ;;  %s3589_s19 = smov [#allocation5]  }
  0x3c   : > { %2942 = vmatprep.subr.bf16.mxu0 %v3319_v0  ;;  %v3322_v3 = vld [vmem:[%s236_s23 + $0x20] sm:$0xff]   ;;  %v3323_v5 = vld [vmem:[%s236_s23 + $0x18] sm:$0xff]   ;;  %v3324_v6 = vld [vmem:[%s236_s23 + $0x10] sm:$0xff]   ;;  %2978 = vmatprep.subr.bf16.mxu1 %v3337_v18  ;;  %s3517_s22 = sshll.u32 %s3589_s19, 4  ;;  %s3518_s22 = int_to_ptr.vmem [resolvable:$false] %s3517_s22 }
  0x3d   : > { %2943 = vmatpush3.bf16.msra.mxu0 %v3319_v0  ;;  %v3325_v9 = vld [vmem:[%s236_s23 + $0x8] sm:$0xff]   ;;  %v3326_v10 = vld [vmem:[%s236_s23] sm:$0xff]   ;;  %s2675_s23 = sshll.u32 %s3712_s13, 3  ;;  %s3519_s8 = scalar_lea.vmem %s3518_s22, 256 }
  0x3e   : > { %2944 = vmatprep.subr.bf16.mxu0 %v3320_v1  ;;  %v2694_v48 = vld [vmem:[%s4344_s3] ss:$0 sm:$0xff] }
  0x3f   : > { %2979 = vmatpush3.bf16.msra.mxu1 %v3337_v18 }
  0x40   : > { %2980 = vmatprep.subr.bf16.mxu1 %v3338_v19 }
  0x41   : > { %2945 = vmatpush3.bf16.msra.mxu0 %v3320_v1 }
  0x42   : > { %2946 = vmatprep.subr.bf16.mxu0 %v3321_v2 }
  0x43   : > { %2981 = vmatpush3.bf16.msra.mxu1 %v3338_v19 }
  0x44   : > { %2998 = vmatprep.subr.bf16.mxu1 %v3339_v20 }
  0x45   : > { %2947 = vmatpush3.bf16.msra.mxu0 %v3321_v2 }
  0x46   : > { %2948 = vmatprep.subr.bf16.mxu0 %v3322_v3 }
  0x49   : > { %2949 = vmatpush3.bf16.msra.mxu0 %v3322_v3 }
  0x4a   : > { %2950 = vmatprep.subr.bf16.mxu0 %v3323_v5 }
  0x4d   : > { %2951 = vmatpush3.bf16.msra.mxu0 %v3323_v5 }
  0x4e   : > { %2952 = vmatprep.subr.bf16.mxu0 %v3324_v6 }
  0x51   : > { %2953 = vmatpush3.bf16.msra.mxu0 %v3324_v6 }
  0x52   : > { %2954 = vmatprep.subr.bf16.mxu0 %v3325_v9 }
  0x55   : > { %2955 = vmatpush3.bf16.msra.mxu0 %v3325_v9 }
  0x56   : > { %2956 = vmatprep.subr.bf16.mxu0 %v3326_v10 }
  0x59   : > { %2957 = vmatpush3.bf16.msra.mxu0 %v3326_v10 }
  0x5c   : > { %2959 = vmatmul.mubr.bf16.vlgmr.msra.gmra.mxu0 %v3737_v11 }
  0x5d   : > { %2962 = vmatprep.mubr.bf16.mxu0 %v3740_v12 }
  0x64   : > { %2963 = vmatmul.mubr.bf16.gmra.mxu0 %v3745_v13 }
  0x65   : > { %2966 = vmatprep.mubr.bf16.mxu0 %v3748_v14 }
  0x6c   : > { %2967 = vmatmul.mubr.bf16.gmra.mxu0 %v3753_v15 }
  0x6d   : > { %2970 = vmatprep.mubr.bf16.mxu0 %v3756_v16 }
  0x74   : > { %2971 = vmatmul.mubr.bf16.gmra.mxu0 %v3761_v17 }
  0x75   : > { %3034 = vmatprep.mubr.bf16.mxu0 %v3727_v4 }
 0x11c   : > { %v2960_v21 = vpop.f32.mrf.mxu0 }
 0x11e   : > { %v416_v22 = vpop.f32.mrf.mxu0 }
 0x120   : > { %v2961_v23 = vpop.f32.mrf.mxu0 }
 0x121   : > { %v480_v26 = vpack.c.bf16 %v2961_v23, %v2960_v21 }
 0x122   : > { %v419_v24 = vpop.f32.mrf.mxu0 }
 0x123   : > { %v479_v25 = vpack.c.bf16 %v419_v24, %v416_v22 }
 0x124   : > { %v2964_v27 = vpop.f32.mrf.mxu0 }
 0x125   : > { %2982 = vmatprep.mubr.msk.bf16.mxu1 %vm515_vm0, %v479_v25 }
 0x126   : > { %v432_v29 = vpop.f32.mrf.mxu0  ;;  %2983 = vmatmul.mubr.msk.bf16.vlgmr.msra.gmra.mxu1 %vm515_vm0, %v480_v26 }
 0x127   : > { %2999 = vmatpush3.bf16.msra.mxu1 %v3339_v20 }
 0x128   : > { %v2965_v30 = vpop.f32.mrf.mxu0  ;;  %3000 = vmatprep.subr.bf16.mxu1 %v3340_v28 }
 0x129   : > { %v482_v33 = vpack.c.bf16 %v2965_v30, %v2964_v27 }
 0x12a   : > { %v435_v31 = vpop.f32.mrf.mxu0 }
 0x12b   : > { %v481_v32 = vpack.c.bf16 %v435_v31, %v432_v29  ;;  %3001 = vmatpush3.bf16.msra.mxu1 %v3340_v28 }
 0x12c   : > { %v2968_v34 = vpop.f32.mrf.mxu0 }
 0x12d   : > { %2986 = vmatprep.mubr.msk.bf16.mxu1 %vm515_vm0, %v481_v32 }
 0x12e   : > { %v448_v35 = vpop.f32.mrf.mxu0  ;;  %2987 = vmatmul.mubr.msk.bf16.gmra.mxu1 %vm515_vm0, %v482_v33 }
 0x130   : > { %v2969_v36 = vpop.f32.mrf.mxu0 }
 0x131   : > { %v484_v39 = vpack.c.bf16 %v2969_v36, %v2968_v34 }
 0x132   : > { %v451_v37 = vpop.f32.mrf.mxu0 }
 0x133   : > { %v483_v38 = vpack.c.bf16 %v451_v37, %v448_v35 }
 0x134   : > { %v2972_v40 = vpop.f32.mrf.mxu0 }
 0x135   : > { %2990 = vmatprep.mubr.msk.bf16.mxu1 %vm515_vm0, %v483_v38 }
 0x136   : > { %v464_v41 = vpop.f32.mrf.mxu0  ;;  %2991 = vmatmul.mubr.msk.bf16.gmra.mxu1 %vm515_vm0, %v484_v39 }
 0x138   : > { %v2973_v42 = vpop.f32.mrf.mxu0 }
 0x139   : > { %v486_v45 = vpack.c.bf16 %v2973_v42, %v2972_v40 }
 0x13a   : > { %v467_v43 = vpop.f32.mrf.mxu0 }
 0x13b   : > { %v485_v44 = vpack.c.bf16 %v467_v43, %v464_v41 }
 0x13d   : > { %2994 = vmatprep.mubr.msk.bf16.mxu1 %vm515_vm0, %v485_v44 }
 0x13e   : > { %2995 = vmatmul.mubr.msk.bf16.gmra.mxu1 %vm515_vm0, %v486_v45 }
 0x1e6   : > { %v2984_v46 = vpop.f32.mrf.mxu1 }
 0x1e7   : > { %v583_v52 = vadd.f32 %v2984_v46, %v2694_v48 }
 0x1e8   : > { %v574_v47 = vpop.f32.mrf.mxu1 }
 0x1e9   : > { %v575_v50 = vadd.f32 %v2694_v48, %v574_v47  ;;  %v639_v59 = vmax.f32 %v583_v52, 0.0  ;;  %v3341_v47 = vld [vmem:[%s4343_s2 + $0x38] sm:$0xff]  }
 0x1ea   : > { %v2985_v49 = vpop.f32.mrf.mxu1  ;;  %3050 = vmatprep.subr.bf16.mxu1 %v3341_v47 }
 0x1eb   : > { %v586_v51 = vadd.f32 %v2985_v49, %v2694_v48  ;;  %v637_v57 = vmax.f32 %v575_v50, 0.0  ;;  %v3342_v49 = vld [vmem:[%s4343_s2 + $0x30] sm:$0xff]  }
 0x1ec   : > { %v577_v53 = vpop.f32.mrf.mxu1 }
 0x1ed   : > { %v578_v54 = vadd.f32 %v2694_v48, %v577_v53  ;;  %v640_v55 = vmax.f32 %v586_v51, 0.0 }
 0x1ee   : > { %v2988_v56 = vpop.f32.mrf.mxu1 }
 0x1ef   : > { %v638_v58 = vmax.f32 %v578_v54, 0.0  ;;  %v654_v62 = vpack.c.bf16 %v640_v55, %v639_v59  ;;  %v599_v2 = vadd.f32 %v2988_v56, %v2694_v48 }
 0x1f0   : > { %v590_v60 = vpop.f32.mrf.mxu1 }
 0x1f1   : > { %v653_v61 = vpack.c.bf16 %v638_v58, %v637_v57  ;;  %v591_v0 = vadd.f32 %v2694_v48, %v590_v60  ;;  %v643_v10 = vmax.f32 %v599_v2, 0.0 }
 0x1f2   : > { %v2989_v63 = vpop.f32.mrf.mxu1 }
 0x1f3   : > { %v602_v1 = vadd.f32 %v2989_v63, %v2694_v48  ;;  %3002 = vmatprep.mubr.msk.bf16.mxu1 %vm677_vm1, %v653_v61  ;;  %v641_v8 = vmax.f32 %v591_v0, 0.0 }
 0x1f4   : > { %v593_v3 = vpop.f32.mrf.mxu1  ;;  %3003 = vmatmul.mubr.msk.bf16.vlgmr.msra.gmra.mxu1 %vm677_vm1, %v654_v62  ;;  %v2707_v62 = vld [vmem:[%s4344_s3 + $0x1] ss:$0 sm:$0xff] }
 0x1f5   : > { %v594_v5 = vadd.f32 %v2694_v48, %v593_v3  ;;  %v644_v6 = vmax.f32 %v602_v1, 0.0  ;;  %3051 = vmatpush3.bf16.msra.mxu1 %v3341_v47 }
 0x1f6   : > { %v2992_v7 = vpop.f32.mrf.mxu1  ;;  %3052 = vmatprep.subr.bf16.mxu1 %v3342_v49 }
 0x1f7   : > { %v642_v9 = vmax.f32 %v594_v5, 0.0  ;;  %v656_v20 = vpack.c.bf16 %v644_v6, %v643_v10  ;;  %v615_v24 = vadd.f32 %v2992_v7, %v2694_v48 }
 0x1f8   : > { %v606_v18 = vpop.f32.mrf.mxu1 }
 0x1f9   : > { %v655_v19 = vpack.c.bf16 %v642_v9, %v641_v8  ;;  %v607_v22 = vadd.f32 %v2694_v48, %v606_v18  ;;  %v647_v31 = vmax.f32 %v615_v24, 0.0  ;;  %3053 = vmatpush3.bf16.msra.mxu1 %v3342_v49 }
 0x1fa   : > { %v2993_v21 = vpop.f32.mrf.mxu1 }
 0x1fb   : > { %v618_v23 = vadd.f32 %v2993_v21, %v2694_v48  ;;  %3006 = vmatprep.mubr.msk.bf16.mxu1 %vm677_vm1, %v655_v19  ;;  %v645_v29 = vmax.f32 %v607_v22, 0.0 }
 0x1fc   : > { %v609_v25 = vpop.f32.mrf.mxu1  ;;  %3007 = vmatmul.mubr.msk.bf16.gmra.mxu1 %vm677_vm1, %v656_v20 }
 0x1fd   : > { %v610_v26 = vadd.f32 %v2694_v48, %v609_v25  ;;  %v648_v27 = vmax.f32 %v618_v23, 0.0 }
 0x1fe   : > { %v2996_v28 = vpop.f32.mrf.mxu1 }
 0x1ff   : > { %v646_v30 = vmax.f32 %v610_v26, 0.0  ;;  %v658_v34 = vpack.c.bf16 %v648_v27, %v647_v31  ;;  %v631_v38 = vadd.f32 %v2996_v28, %v2694_v48 }
 0x200   : > { %v622_v32 = vpop.f32.mrf.mxu1 }
 0x201   : > { %v657_v33 = vpack.c.bf16 %v646_v30, %v645_v29  ;;  %v623_v36 = vadd.f32 %v2694_v48, %v622_v32  ;;  %v651_v44 = vmax.f32 %v631_v38, 0.0 }
 0x202   : > { %v2997_v35 = vpop.f32.mrf.mxu1 }
 0x203   : > { %v634_v37 = vadd.f32 %v2997_v35, %v2694_v48  ;;  %3010 = vmatprep.mubr.msk.bf16.mxu1 %vm677_vm1, %v657_v33  ;;  %v649_v42 = vmax.f32 %v623_v36, 0.0 }
 0x204   : > { %v625_v39 = vpop.f32.mrf.mxu1  ;;  %3011 = vmatmul.mubr.msk.bf16.gmra.mxu1 %vm677_vm1, %v658_v34 }
 0x205   : > { %v626_v40 = vadd.f32 %v2694_v48, %v625_v39  ;;  %v652_v41 = vmax.f32 %v634_v37, 0.0 }
 0x207   : > { %v650_v43 = vmax.f32 %v626_v40, 0.0  ;;  %v660_v46 = vpack.c.bf16 %v652_v41, %v651_v44 }
 0x209   : > { %v659_v45 = vpack.c.bf16 %v650_v43, %v649_v42 }
 0x20b   : > { %3014 = vmatprep.mubr.msk.bf16.mxu1 %vm677_vm1, %v659_v45 }
 0x20c   : > { %3015 = vmatmul.mubr.msk.bf16.gmra.mxu1 %vm677_vm1, %v660_v46 }
 0x2b4   : > { %v3004_v48 = vpop.f32.mrf.mxu1 }
 0x2b5   : > { %v745_v39 = vadd.f32 %v3004_v48, %v2707_v62  ;;  %v3343_v48 = vld [vmem:[%s4343_s2 + $0x48] sm:$0xff]  }
 0x2b6   : > { %v736_v50 = vpop.f32.mrf.mxu1 }
 0x2b7   : > { %v801_v44 = vmax.f32 %v745_v39, 0.0  ;;  %v737_v45 = vadd.f32 %v2707_v62, %v736_v50  ;;  %v3344_v50 = vld [vmem:[%s4343_s2 + $0x40] sm:$0xff]  }
 0x2b8   : > { %v3005_v51 = vpop.f32.mrf.mxu1 }
 0x2b9   : > { %v748_v36 = vadd.f32 %v3005_v51, %v2707_v62  ;;  %v799_v49 = vmax.f32 %v737_v45, 0.0 }
 0x2ba   : > { %v739_v52 = vpop.f32.mrf.mxu1 }
 0x2bb   : > { %v802_v41 = vmax.f32 %v748_v36, 0.0  ;;  %v740_v42 = vadd.f32 %v2707_v62, %v739_v52 }
 0x2bc   : > { %v3008_v53 = vpop.f32.mrf.mxu1 }
 0x2bd   : > { %v761_v29 = vadd.f32 %v3008_v53, %v2707_v62  ;;  %v826_v46 = vpack.c.bf16 %v802_v41, %v801_v44  ;;  %v800_v47 = vmax.f32 %v740_v42, 0.0 }
 0x2be   : > { %v752_v54 = vpop.f32.mrf.mxu1 }
 0x2bf   : > { %v805_v34 = vmax.f32 %v761_v29, 0.0  ;;  %v753_v35 = vadd.f32 %v2707_v62, %v752_v54  ;;  %v825_v53 = vpack.c.bf16 %v800_v47, %v799_v49 }
 0x2c0   : > { %v3009_v55 = vpop.f32.mrf.mxu1 }
 0x2c1   : > { %v764_v26 = vadd.f32 %v3009_v55, %v2707_v62  ;;  %v803_v40 = vmax.f32 %v753_v35, 0.0 }
 0x2c2   : > { %v755_v56 = vpop.f32.mrf.mxu1 }
 0x2c3   : > { %v806_v31 = vmax.f32 %v764_v26, 0.0  ;;  %v756_v32 = vadd.f32 %v2707_v62, %v755_v56 }
 0x2c4   : > { %v3012_v57 = vpop.f32.mrf.mxu1 }
 0x2c5   : > { %v777_v10 = vadd.f32 %v3012_v57, %v2707_v62  ;;  %v828_v37 = vpack.c.bf16 %v806_v31, %v805_v34  ;;  %v804_v38 = vmax.f32 %v756_v32, 0.0 }
 0x2c6   : > { %v768_v58 = vpop.f32.mrf.mxu1 }
 0x2c7   : > { %v809_v24 = vmax.f32 %v777_v10, 0.0  ;;  %v769_v25 = vadd.f32 %v2707_v62, %v768_v58  ;;  %v827_v43 = vpack.c.bf16 %v804_v38, %v803_v40 }
 0x2c8   : > { %v3013_v59 = vpop.f32.mrf.mxu1 }
 0x2c9   : > { %v780_v6 = vadd.f32 %v3013_v59, %v2707_v62  ;;  %v807_v30 = vmax.f32 %v769_v25, 0.0 }
 0x2ca   : > { %v771_v60 = vpop.f32.mrf.mxu1 }
 0x2cb   : > { %v810_v21 = vmax.f32 %v780_v6, 0.0  ;;  %v772_v22 = vadd.f32 %v2707_v62, %v771_v60 }
 0x2cc   : > { %v3016_v61 = vpop.f32.mrf.mxu1 }
 0x2cd   : > { %v793_v0 = vadd.f32 %v3016_v61, %v2707_v62  ;;  %v830_v27 = vpack.c.bf16 %v810_v21, %v809_v24  ;;  %v808_v28 = vmax.f32 %v772_v22, 0.0  ;;  %v2718_v22 = vld [vmem:[%s4344_s3 + $0x2] ss:$0 sm:$0xff] }
 0x2ce   : > { %v784_v63 = vpop.f32.mrf.mxu1 }
 0x2cf   : > { %v785_v2 = vadd.f32 %v2707_v62, %v784_v63  ;;  %v813_v7 = vmax.f32 %v793_v0, 0.0  ;;  %v829_v33 = vpack.c.bf16 %v808_v28, %v807_v30 }
 0x2d0   : > { %v3017_v1 = vpop.f32.mrf.mxu1 }
 0x2d1   : > { %v796_v3 = vadd.f32 %v3017_v1, %v2707_v62  ;;  %v811_v18 = vmax.f32 %v785_v2, 0.0 }
 0x2d2   : > { %v787_v5 = vpop.f32.mrf.mxu1 }
 0x2d3   : > { %v814_v8 = vmax.f32 %v796_v3, 0.0  ;;  %v788_v9 = vadd.f32 %v2707_v62, %v787_v5 }
 0x2d5   : > { %v832_v19 = vpack.c.bf16 %v814_v8, %v813_v7  ;;  %v812_v20 = vmax.f32 %v788_v9, 0.0 }
 0x2d7   : > { %v831_v23 = vpack.c.bf16 %v812_v20, %v811_v18  ;;  %3018 = vmatprep.subr.bf16.mxu0 %v832_v19 }
 0x2d8   : > { %3019 = vmatpush3.bf16.msra.mxu0 %v832_v19 }
 0x2d9   : > { %3020 = vmatprep.subr.bf16.mxu0 %v831_v23 }
 0x2dc   : > { %3021 = vmatpush3.bf16.msra.mxu0 %v831_v23 }
 0x2dd   : > { %3022 = vmatprep.subr.bf16.mxu0 %v830_v27 }
 0x2e0   : > { %3023 = vmatpush3.bf16.msra.mxu0 %v830_v27 }
 0x2e1   : > { %3024 = vmatprep.subr.bf16.mxu0 %v829_v33 }
 0x2e4   : > { %3025 = vmatpush3.bf16.msra.mxu0 %v829_v33 }
 0x2e5   : > { %3026 = vmatprep.subr.bf16.mxu0 %v828_v37 }
 0x2e8   : > { %3027 = vmatpush3.bf16.msra.mxu0 %v828_v37 }
 0x2e9   : > { %3028 = vmatprep.subr.bf16.mxu0 %v827_v43 }
 0x2ec   : > { %3029 = vmatpush3.bf16.msra.mxu0 %v827_v43 }
 0x2ed   : > { %3030 = vmatprep.subr.bf16.mxu0 %v826_v46 }
 0x2f0   : > { %3031 = vmatpush3.bf16.msra.mxu0 %v826_v46 }
 0x2f1   : > { %3032 = vmatprep.subr.bf16.mxu0 %v825_v53 }
 0x2f4   : > { %3033 = vmatpush3.bf16.msra.mxu0 %v825_v53 }
 0x2f5   : > { %3070 = vmatprep.subr.bf16.mxu0 %v3343_v48 }
 0x2f7   : > { %3035 = vmatmul.mubr.bf16.vlgmr.msra.gmra.mxu0 %v3737_v11 }
 0x2f8   : > { %3038 = vmatprep.mubr.bf16.mxu0 %v3740_v12  ;;  %3071 = vmatpush3.bf16.msra.mxu0 %v3343_v48 }
 0x2f9   : > { %3072 = vmatprep.subr.bf16.mxu0 %v3344_v50 }
 0x2fc   : > { %3073 = vmatpush3.bf16.msra.mxu0 %v3344_v50 }
 0x2ff   : > { %3039 = vmatmul.mubr.bf16.gmra.mxu0 %v3745_v13 }
 0x300   : > { %3042 = vmatprep.mubr.bf16.mxu0 %v3748_v14 }
 0x307   : > { %3043 = vmatmul.mubr.bf16.gmra.mxu0 %v3753_v15 }
 0x308   : > { %3046 = vmatprep.mubr.bf16.mxu0 %v3756_v16 }
 0x30f   : > { %3047 = vmatmul.mubr.bf16.gmra.mxu0 %v3761_v17 }
 0x3b7   : > { %v3036_v51 = vpop.f32.mrf.mxu0 }
 0x3b9   : > { %v867_v52 = vpop.f32.mrf.mxu0 }
 0x3bb   : > { %v3037_v54 = vpop.f32.mrf.mxu0 }
 0x3bc   : > { %v931_v57 = vpack.c.bf16 %v3037_v54, %v3036_v51 }
 0x3bd   : > { %v870_v55 = vpop.f32.mrf.mxu0 }
 0x3be   : > { %v930_v56 = vpack.c.bf16 %v870_v55, %v867_v52 }
 0x3bf   : > { %v3040_v58 = vpop.f32.mrf.mxu0 }
 0x3c0   : > { %3054 = vmatprep.mubr.msk.bf16.mxu1 %vm677_vm1, %v930_v56 }
 0x3c1   : > { %v883_v59 = vpop.f32.mrf.mxu0  ;;  %3055 = vmatmul.mubr.msk.bf16.vlgmr.msra.gmra.mxu1 %vm677_vm1, %v931_v57 }
 0x3c3   : > { %v3041_v60 = vpop.f32.mrf.mxu0 }
 0x3c4   : > { %v933_v63 = vpack.c.bf16 %v3041_v60, %v3040_v58 }
 0x3c5   : > { %v886_v61 = vpop.f32.mrf.mxu0 }
 0x3c6   : > { %v932_v62 = vpack.c.bf16 %v886_v61, %v883_v59 }
 0x3c7   : > { %v3044_v0 = vpop.f32.mrf.mxu0 }
 0x3c8   : > { %3058 = vmatprep.mubr.msk.bf16.mxu1 %vm677_vm1, %v932_v62 }
 0x3c9   : > { %v899_v1 = vpop.f32.mrf.mxu0  ;;  %3059 = vmatmul.mubr.msk.bf16.gmra.mxu1 %vm677_vm1, %v933_v63 }
 0x3cb   : > { %v3045_v2 = vpop.f32.mrf.mxu0 }
 0x3cc   : > { %v935_v6 = vpack.c.bf16 %v3045_v2, %v3044_v0 }
 0x3cd   : > { %v902_v3 = vpop.f32.mrf.mxu0 }
 0x3ce   : > { %v934_v5 = vpack.c.bf16 %v902_v3, %v899_v1 }
 0x3cf   : > { %v3048_v7 = vpop.f32.mrf.mxu0 }
 0x3d0   : > { %3062 = vmatprep.mubr.msk.bf16.mxu1 %vm677_vm1, %v934_v5 }
 0x3d1   : > { %v915_v8 = vpop.f32.mrf.mxu0  ;;  %3063 = vmatmul.mubr.msk.bf16.gmra.mxu1 %vm677_vm1, %v935_v6 }
 0x3d3   : > { %v3049_v9 = vpop.f32.mrf.mxu0 }
 0x3d4   : > { %v937_v19 = vpack.c.bf16 %v3049_v9, %v3048_v7 }
 0x3d5   : > { %v918_v10 = vpop.f32.mrf.mxu0 }
 0x3d6   : > { %v936_v18 = vpack.c.bf16 %v918_v10, %v915_v8 }
 0x3d8   : > { %3066 = vmatprep.mubr.msk.bf16.mxu1 %vm677_vm1, %v936_v18 }
 0x3d9   : > { %3067 = vmatmul.mubr.msk.bf16.gmra.mxu1 %vm677_vm1, %v937_v19 }
 0x3da   : > { %3106 = vmatprep.mubr.bf16.mxu1 %v3727_v4 }
 0x481   : > { %v3056_v20 = vpop.f32.mrf.mxu1 }
 0x482   : > { %v1021_v26 = vadd.f32 %v3056_v20, %v2718_v22  ;;  %v3345_v20 = vld [vmem:[%s4343_s2 + $0x58] sm:$0xff]  }
 0x483   : > { %v1012_v21 = vpop.f32.mrf.mxu1  ;;  %3122 = vmatprep.subr.bf16.mxu0 %v3345_v20 }
 0x484   : > { %v1013_v24 = vadd.f32 %v2718_v22, %v1012_v21  ;;  %v1077_v33 = vmax.f32 %v1021_v26, 0.0  ;;  %v3346_v21 = vld [vmem:[%s4343_s2 + $0x50] sm:$0xff]  }
 0x485   : > { %v3057_v23 = vpop.f32.mrf.mxu1 }
 0x486   : > { %v1024_v25 = vadd.f32 %v3057_v23, %v2718_v22  ;;  %v1075_v31 = vmax.f32 %v1013_v24, 0.0 }
 0x487   : > { %v1015_v27 = vpop.f32.mrf.mxu1 }
 0x488   : > { %v1016_v28 = vadd.f32 %v2718_v22, %v1015_v27  ;;  %v1078_v29 = vmax.f32 %v1024_v25, 0.0 }
 0x489   : > { %v3060_v30 = vpop.f32.mrf.mxu1 }
 0x48a   : > { %v1076_v32 = vmax.f32 %v1016_v28, 0.0  ;;  %v1092_v4 = vpack.c.bf16 %v1078_v29, %v1077_v33  ;;  %v1037_v39 = vadd.f32 %v3060_v30, %v2718_v22 }
 0x48b   : > { %v1028_v34 = vpop.f32.mrf.mxu1 }
 0x48c   : > { %v1091_v35 = vpack.c.bf16 %v1076_v32, %v1075_v31  ;;  %v1029_v37 = vadd.f32 %v2718_v22, %v1028_v34  ;;  %v1081_v46 = vmax.f32 %v1037_v39, 0.0 }
 0x48d   : > { %v3061_v36 = vpop.f32.mrf.mxu1 }
 0x48e   : > { %v1040_v38 = vadd.f32 %v3061_v36, %v2718_v22  ;;  %3074 = vmatprep.mubr.msk.bf16.mxu0 %vm677_vm1, %v1091_v35  ;;  %v1079_v44 = vmax.f32 %v1029_v37, 0.0  ;;  %v2729_v35 = vld [vmem:[%s4344_s3 + $0x3] ss:$0 sm:$0xff] }
 0x48f   : > { %v1031_v40 = vpop.f32.mrf.mxu1  ;;  %3075 = vmatmul.mubr.msk.bf16.vlgmr.msra.gmra.mxu0 %vm677_vm1, %v1092_v4 }
 0x490   : > { %v1032_v41 = vadd.f32 %v2718_v22, %v1031_v40  ;;  %v1082_v42 = vmax.f32 %v1040_v38, 0.0  ;;  %3123 = vmatpush3.bf16.msra.mxu0 %v3345_v20 }
 0x491   : > { %v3064_v43 = vpop.f32.mrf.mxu1  ;;  %3124 = vmatprep.subr.bf16.mxu0 %v3346_v21 }
 0x492   : > { %v1080_v45 = vmax.f32 %v1032_v41, 0.0  ;;  %v1094_v53 = vpack.c.bf16 %v1082_v42, %v1081_v46  ;;  %v1053_v52 = vadd.f32 %v3064_v43, %v2718_v22 }
 0x493   : > { %v1044_v47 = vpop.f32.mrf.mxu1 }
 0x494   : > { %v1093_v49 = vpack.c.bf16 %v1080_v45, %v1079_v44  ;;  %v1045_v50 = vadd.f32 %v2718_v22, %v1044_v47  ;;  %v1085_v60 = vmax.f32 %v1053_v52, 0.0  ;;  %3125 = vmatpush3.bf16.msra.mxu0 %v3346_v21 }
 0x495   : > { %v3065_v48 = vpop.f32.mrf.mxu1 }
 0x496   : > { %v1056_v51 = vadd.f32 %v3065_v48, %v2718_v22  ;;  %3078 = vmatprep.mubr.msk.bf16.mxu0 %vm677_vm1, %v1093_v49  ;;  %v1083_v58 = vmax.f32 %v1045_v50, 0.0 }
 0x497   : > { %v1047_v54 = vpop.f32.mrf.mxu1  ;;  %3079 = vmatmul.mubr.msk.bf16.gmra.mxu0 %vm677_vm1, %v1094_v53 }
 0x498   : > { %v1048_v55 = vadd.f32 %v2718_v22, %v1047_v54  ;;  %v1086_v56 = vmax.f32 %v1056_v51, 0.0 }
 0x499   : > { %v3068_v57 = vpop.f32.mrf.mxu1 }
 0x49a   : > { %v1084_v59 = vmax.f32 %v1048_v55, 0.0  ;;  %v1096_v63 = vpack.c.bf16 %v1086_v56, %v1085_v60  ;;  %v1069_v3 = vadd.f32 %v3068_v57, %v2718_v22 }
 0x49b   : > { %v1060_v61 = vpop.f32.mrf.mxu1 }
 0x49c   : > { %v1095_v62 = vpack.c.bf16 %v1084_v59, %v1083_v58  ;;  %v1061_v1 = vadd.f32 %v2718_v22, %v1060_v61  ;;  %v1089_v10 = vmax.f32 %v1069_v3, 0.0 }
 0x49d   : > { %v3069_v0 = vpop.f32.mrf.mxu1 }
 0x49e   : > { %v1072_v2 = vadd.f32 %v3069_v0, %v2718_v22  ;;  %3082 = vmatprep.mubr.msk.bf16.mxu0 %vm677_vm1, %v1095_v62  ;;  %v1087_v8 = vmax.f32 %v1061_v1, 0.0 }
 0x49f   : > { %v1063_v5 = vpop.f32.mrf.mxu1  ;;  %3083 = vmatmul.mubr.msk.bf16.gmra.mxu0 %vm677_vm1, %v1096_v63 }
 0x4a0   : > { %v1064_v6 = vadd.f32 %v2718_v22, %v1063_v5  ;;  %v1090_v7 = vmax.f32 %v1072_v2, 0.0 }
 0x4a2   : > { %v1088_v9 = vmax.f32 %v1064_v6, 0.0  ;;  %v1098_v19 = vpack.c.bf16 %v1090_v7, %v1089_v10 }
 0x4a4   : > { %v1097_v18 = vpack.c.bf16 %v1088_v9, %v1087_v8 }
 0x4a6   : > { %3086 = vmatprep.mubr.msk.bf16.mxu0 %vm677_vm1, %v1097_v18 }
 0x4a7   : > { %3087 = vmatmul.mubr.msk.bf16.gmra.mxu0 %vm677_vm1, %v1098_v19 }
 0x54f   : > { %v3076_v22 = vpop.f32.mrf.mxu0 }
 0x550   : > { %v1182_v3 = vadd.f32 %v3076_v22, %v2729_v35  ;;  %v3347_v22 = vld [vmem:[%s4343_s2 + $0x68] sm:$0xff]  }
 0x551   : > { %v1173_v23 = vpop.f32.mrf.mxu0 }
 0x552   : > { %v1238_v9 = vmax.f32 %v1182_v3, 0.0  ;;  %v1174_v10 = vadd.f32 %v2729_v35, %v1173_v23 }
 0x553   : > { %v3077_v24 = vpop.f32.mrf.mxu0 }
 0x554   : > { %v1185_v0 = vadd.f32 %v3077_v24, %v2729_v35  ;;  %v1236_v20 = vmax.f32 %v1174_v10, 0.0 }
 0x555   : > { %v1176_v25 = vpop.f32.mrf.mxu0 }
 0x556   : > { %v1239_v6 = vmax.f32 %v1185_v0, 0.0  ;;  %v1177_v7 = vadd.f32 %v2729_v35, %v1176_v25 }
 0x557   : > { %v3080_v26 = vpop.f32.mrf.mxu0 }
 0x558   : > { %v1198_v57 = vadd.f32 %v3080_v26, %v2729_v35  ;;  %v1263_v18 = vpack.c.bf16 %v1239_v6, %v1238_v9  ;;  %v1237_v19 = vmax.f32 %v1177_v7, 0.0 }
 0x559   : > { %v1189_v27 = vpop.f32.mrf.mxu0 }
 0x55a   : > { %v1242_v62 = vmax.f32 %v1198_v57, 0.0  ;;  %v1190_v63 = vadd.f32 %v2729_v35, %v1189_v27  ;;  %v1262_v21 = vpack.c.bf16 %v1237_v19, %v1236_v20 }
 0x55b   : > { %v3081_v28 = vpop.f32.mrf.mxu0 }
 0x55c   : > { %v1201_v54 = vadd.f32 %v3081_v28, %v2729_v35  ;;  %v1240_v5 = vmax.f32 %v1190_v63, 0.0 }
 0x55d   : > { %v1192_v29 = vpop.f32.mrf.mxu0 }
 0x55e   : > { %v1243_v59 = vmax.f32 %v1201_v54, 0.0  ;;  %v1193_v60 = vadd.f32 %v2729_v35, %v1192_v29 }
 0x55f   : > { %v3084_v30 = vpop.f32.mrf.mxu0 }
 0x560   : > { %v1214_v45 = vadd.f32 %v3084_v30, %v2729_v35  ;;  %v1265_v1 = vpack.c.bf16 %v1243_v59, %v1242_v62  ;;  %v1241_v2 = vmax.f32 %v1193_v60, 0.0 }
 0x561   : > { %v1205_v31 = vpop.f32.mrf.mxu0 }
 0x562   : > { %v1246_v51 = vmax.f32 %v1214_v45, 0.0  ;;  %v1206_v52 = vadd.f32 %v2729_v35, %v1205_v31  ;;  %v1264_v8 = vpack.c.bf16 %v1241_v2, %v1240_v5 }
 0x563   : > { %v3085_v32 = vpop.f32.mrf.mxu0 }
 0x564   : > { %v1217_v41 = vadd.f32 %v3085_v32, %v2729_v35  ;;  %v1244_v58 = vmax.f32 %v1206_v52, 0.0 }
 0x565   : > { %v1208_v33 = vpop.f32.mrf.mxu0 }
 0x566   : > { %v1247_v53 = vmax.f32 %v1217_v41, 0.0  ;;  %v1209_v48 = vadd.f32 %v2729_v35, %v1208_v33  ;;  %v3350_v41 = vld [vmem:[%s4343_s2 + $0x80] sm:$0xff]  }
 0x567   : > { %v3088_v34 = vpop.f32.mrf.mxu0 }
 0x568   : > { %v1230_v36 = vadd.f32 %v3088_v34, %v2729_v35  ;;  %v1267_v55 = vpack.c.bf16 %v1247_v53, %v1246_v51  ;;  %v1245_v56 = vmax.f32 %v1209_v48, 0.0 }
 0x569   : > { %v1221_v4 = vpop.f32.mrf.mxu0 }
 0x56a   : > { %v1222_v38 = vadd.f32 %v2729_v35, %v1221_v4  ;;  %v1250_v42 = vmax.f32 %v1230_v36, 0.0  ;;  %v1266_v61 = vpack.c.bf16 %v1245_v56, %v1244_v58 }
 0x56b   : > { %v3089_v37 = vpop.f32.mrf.mxu0 }
 0x56c   : > { %v1233_v39 = vadd.f32 %v3089_v37, %v2729_v35  ;;  %v1248_v46 = vmax.f32 %v1222_v38, 0.0 }
 0x56d   : > { %v1224_v40 = vpop.f32.mrf.mxu0 }
 0x56e   : > { %v1251_v43 = vmax.f32 %v1233_v39, 0.0  ;;  %v1225_v44 = vadd.f32 %v2729_v35, %v1224_v40  ;;  %v3349_v40 = vld [vmem:[%s4343_s2 + $0x88] sm:$0xff]  }
 0x56f   : > { %3162 = vmatprep.subr.bf16.mxu0 %v3349_v40 }
 0x570   : > { %v1269_v47 = vpack.c.bf16 %v1251_v43, %v1250_v42  ;;  %v1249_v49 = vmax.f32 %v1225_v44, 0.0  ;;  %v2740_v44 = vld [vmem:[%s4344_s3 + $0x4] ss:$0 sm:$0xff] }
 0x572   : > { %v1268_v50 = vpack.c.bf16 %v1249_v49, %v1248_v46  ;;  %3090 = vmatprep.subr.bf16.mxu1 %v1269_v47 }
 0x573   : > { %3091 = vmatpush3.bf16.msra.mxu1 %v1269_v47 }
 0x574   : > { %3092 = vmatprep.subr.bf16.mxu1 %v1268_v50 }
 0x577   : > { %3093 = vmatpush3.bf16.msra.mxu1 %v1268_v50 }
 0x578   : > { %3094 = vmatprep.subr.bf16.mxu1 %v1267_v55 }
 0x57b   : > { %3095 = vmatpush3.bf16.msra.mxu1 %v1267_v55 }
 0x57c   : > { %3096 = vmatprep.subr.bf16.mxu1 %v1266_v61 }
 0x57f   : > { %3097 = vmatpush3.bf16.msra.mxu1 %v1266_v61 }
 0x580   : > { %3098 = vmatprep.subr.bf16.mxu1 %v1265_v1 }
 0x583   : > { %3099 = vmatpush3.bf16.msra.mxu1 %v1265_v1 }
 0x584   : > { %3100 = vmatprep.subr.bf16.mxu1 %v1264_v8 }
 0x587   : > { %3101 = vmatpush3.bf16.msra.mxu1 %v1264_v8 }
 0x588   : > { %3102 = vmatprep.subr.bf16.mxu1 %v1263_v18 }
 0x58b   : > { %3103 = vmatpush3.bf16.msra.mxu1 %v1263_v18 }
 0x58c   : > { %3104 = vmatprep.subr.bf16.mxu1 %v1262_v21 }
 0x58f   : > { %3105 = vmatpush3.bf16.msra.mxu1 %v1262_v21 }
 0x590   : > { %3142 = vmatprep.subr.bf16.mxu1 %v3347_v22 }
 0x592   : > { %3107 = vmatmul.mubr.bf16.vlgmr.msra.gmra.mxu1 %v3737_v11  ;;  %v3348_v11 = vld [vmem:[%s4343_s2 + $0x60] sm:$0xff]  }
 0x593   : > { %3110 = vmatprep.mubr.bf16.mxu1 %v3740_v12  ;;  %3143 = vmatpush3.bf16.msra.mxu1 %v3347_v22 }
 0x594   : > { %3144 = vmatprep.subr.bf16.mxu1 %v3348_v11 }
 0x597   : > { %3145 = vmatpush3.bf16.msra.mxu1 %v3348_v11 }
 0x59a   : > { %3111 = vmatmul.mubr.bf16.gmra.mxu1 %v3745_v13 }
 0x59b   : > { %3114 = vmatprep.mubr.bf16.mxu1 %v3748_v14 }
 0x5a2   : > { %3115 = vmatmul.mubr.bf16.gmra.mxu1 %v3753_v15 }
 0x5a3   : > { %3118 = vmatprep.mubr.bf16.mxu1 %v3756_v16 }
 0x5aa   : > { %3119 = vmatmul.mubr.bf16.gmra.mxu1 %v3761_v17 }
 0x652   : > { %v3108_v12 = vpop.f32.mrf.mxu1 }
 0x654   : > { %v1304_v13 = vpop.f32.mrf.mxu1 }
 0x656   : > { %v3109_v14 = vpop.f32.mrf.mxu1 }
 0x657   : > { %v1368_v16 = vpack.c.bf16 %v3109_v14, %v3108_v12 }
 0x658   : > { %v1307_v15 = vpop.f32.mrf.mxu1 }
 0x659   : > { %v1367_v23 = vpack.c.bf16 %v1307_v15, %v1304_v13 }
 0x65a   : > { %v3112_v24 = vpop.f32.mrf.mxu1 }
 0x65b   : > { %3126 = vmatprep.mubr.msk.bf16.mxu0 %vm677_vm1, %v1367_v23 }
 0x65c   : > { %v1320_v17 = vpop.f32.mrf.mxu1  ;;  %3127 = vmatmul.mubr.msk.bf16.vlgmr.msra.gmra.mxu0 %vm677_vm1, %v1368_v16 }
 0x65d   : > { %3163 = vmatpush3.bf16.msra.mxu0 %v3349_v40 }
 0x65e   : > { %v3113_v25 = vpop.f32.mrf.mxu1  ;;  %3164 = vmatprep.subr.bf16.mxu0 %v3350_v41 }
 0x65f   : > { %v1370_v28 = vpack.c.bf16 %v3113_v25, %v3112_v24 }
 0x660   : > { %v1323_v26 = vpop.f32.mrf.mxu1 }
 0x661   : > { %v1369_v27 = vpack.c.bf16 %v1323_v26, %v1320_v17  ;;  %3165 = vmatpush3.bf16.msra.mxu0 %v3350_v41 }
 0x662   : > { %v3116_v29 = vpop.f32.mrf.mxu1 }
 0x663   : > { %3130 = vmatprep.mubr.msk.bf16.mxu0 %vm677_vm1, %v1369_v27 }
 0x664   : > { %v1336_v30 = vpop.f32.mrf.mxu1  ;;  %3131 = vmatmul.mubr.msk.bf16.gmra.mxu0 %vm677_vm1, %v1370_v28 }
 0x666   : > { %v3117_v31 = vpop.f32.mrf.mxu1 }
 0x667   : > { %v1372_v34 = vpack.c.bf16 %v3117_v31, %v3116_v29 }
 0x668   : > { %v1339_v32 = vpop.f32.mrf.mxu1 }
 0x669   : > { %v1371_v33 = vpack.c.bf16 %v1339_v32, %v1336_v30 }
 0x66a   : > { %v3120_v35 = vpop.f32.mrf.mxu1 }
 0x66b   : > { %3134 = vmatprep.mubr.msk.bf16.mxu0 %vm677_vm1, %v1371_v33 }
 0x66c   : > { %v1352_v4 = vpop.f32.mrf.mxu1  ;;  %3135 = vmatmul.mubr.msk.bf16.gmra.mxu0 %vm677_vm1, %v1372_v34 }
 0x66e   : > { %v3121_v36 = vpop.f32.mrf.mxu1 }
 0x66f   : > { %v1374_v39 = vpack.c.bf16 %v3121_v36, %v3120_v35 }
 0x670   : > { %v1355_v37 = vpop.f32.mrf.mxu1 }
 0x671   : > { %v1373_v38 = vpack.c.bf16 %v1355_v37, %v1352_v4  ;;  %v2751_v37 = vld [vmem:[%s4344_s3 + $0x5] ss:$0 sm:$0xff] }
 0x673   : > { %3138 = vmatprep.mubr.msk.bf16.mxu0 %vm677_vm1, %v1373_v38 }
 0x674   : > { %3139 = vmatmul.mubr.msk.bf16.gmra.mxu0 %vm677_vm1, %v1374_v39 }
 0x71c   : > { %v3128_v42 = vpop.f32.mrf.mxu0 }
 0x71d   : > { %v1458_v49 = vadd.f32 %v3128_v42, %v2740_v44 }
 0x71e   : > { %v1449_v43 = vpop.f32.mrf.mxu0 }
 0x71f   : > { %v1450_v46 = vadd.f32 %v2740_v44, %v1449_v43  ;;  %v1514_v55 = vmax.f32 %v1458_v49, 0.0 }
 0x720   : > { %v3129_v45 = vpop.f32.mrf.mxu0 }
 0x721   : > { %v1461_v47 = vadd.f32 %v3129_v45, %v2740_v44  ;;  %v1512_v52 = vmax.f32 %v1450_v46, 0.0 }
 0x722   : > { %v1452_v53 = vpop.f32.mrf.mxu0 }
 0x723   : > { %v1453_v48 = vadd.f32 %v2740_v44, %v1452_v53  ;;  %v1515_v50 = vmax.f32 %v1461_v47, 0.0 }
 0x724   : > { %v3132_v51 = vpop.f32.mrf.mxu0 }
 0x725   : > { %v1513_v54 = vmax.f32 %v1453_v48, 0.0  ;;  %v1529_v58 = vpack.c.bf16 %v1515_v50, %v1514_v55  ;;  %v1474_v62 = vadd.f32 %v3132_v51, %v2740_v44 }
 0x726   : > { %v1465_v56 = vpop.f32.mrf.mxu0 }
 0x727   : > { %v1528_v57 = vpack.c.bf16 %v1513_v54, %v1512_v52  ;;  %v1466_v60 = vadd.f32 %v2740_v44, %v1465_v56  ;;  %v1518_v6 = vmax.f32 %v1474_v62, 0.0 }
 0x728   : > { %v3133_v59 = vpop.f32.mrf.mxu0 }
 0x729   : > { %v1477_v61 = vadd.f32 %v3133_v59, %v2740_v44  ;;  %3146 = vmatprep.mubr.msk.bf16.mxu1 %vm677_vm1, %v1528_v57  ;;  %v1516_v3 = vmax.f32 %v1466_v60, 0.0 }
 0x72a   : > { %v1468_v63 = vpop.f32.mrf.mxu0  ;;  %3147 = vmatmul.mubr.msk.bf16.vlgmr.msra.gmra.mxu1 %vm677_vm1, %v1529_v58 }
 0x72b   : > { %v1469_v0 = vadd.f32 %v2740_v44, %v1468_v63  ;;  %v1519_v1 = vmax.f32 %v1477_v61, 0.0 }
 0x72c   : > { %v3136_v2 = vpop.f32.mrf.mxu0 }
 0x72d   : > { %v1517_v5 = vmax.f32 %v1469_v0, 0.0  ;;  %v1531_v9 = vpack.c.bf16 %v1519_v1, %v1518_v6  ;;  %v1490_v20 = vadd.f32 %v3136_v2, %v2740_v44 }
 0x72e   : > { %v1481_v7 = vpop.f32.mrf.mxu0 }
 0x72f   : > { %v1530_v8 = vpack.c.bf16 %v1517_v5, %v1516_v3  ;;  %v1482_v18 = vadd.f32 %v2740_v44, %v1481_v7  ;;  %v1522_v15 = vmax.f32 %v1490_v20, 0.0 }
 0x730   : > { %v3137_v10 = vpop.f32.mrf.mxu0 }
 0x731   : > { %v1493_v19 = vadd.f32 %v3137_v10, %v2740_v44  ;;  %3150 = vmatprep.mubr.msk.bf16.mxu1 %vm677_vm1, %v1530_v8  ;;  %v1520_v13 = vmax.f32 %v1482_v18, 0.0 }
 0x732   : > { %v1484_v21 = vpop.f32.mrf.mxu0  ;;  %3151 = vmatmul.mubr.msk.bf16.gmra.mxu1 %vm677_vm1, %v1531_v9 }
 0x733   : > { %v1485_v22 = vadd.f32 %v2740_v44, %v1484_v21  ;;  %v1523_v11 = vmax.f32 %v1493_v19, 0.0 }
 0x734   : > { %v3140_v12 = vpop.f32.mrf.mxu0 }
 0x735   : > { %v1521_v14 = vmax.f32 %v1485_v22, 0.0  ;;  %v1533_v24 = vpack.c.bf16 %v1523_v11, %v1522_v15  ;;  %v1506_v27 = vadd.f32 %v3140_v12, %v2740_v44 }
 0x736   : > { %v1497_v23 = vpop.f32.mrf.mxu0 }
 0x737   : > { %v1532_v16 = vpack.c.bf16 %v1521_v14, %v1520_v13  ;;  %v1498_v25 = vadd.f32 %v2740_v44, %v1497_v23  ;;  %v1526_v33 = vmax.f32 %v1506_v27, 0.0 }
 0x738   : > { %v3141_v17 = vpop.f32.mrf.mxu0 }
 0x739   : > { %v1509_v26 = vadd.f32 %v3141_v17, %v2740_v44  ;;  %3154 = vmatprep.mubr.msk.bf16.mxu1 %vm677_vm1, %v1532_v16  ;;  %v1524_v31 = vmax.f32 %v1498_v25, 0.0 }
 0x73a   : > { %v1500_v28 = vpop.f32.mrf.mxu0  ;;  %3155 = vmatmul.mubr.msk.bf16.gmra.mxu1 %vm677_vm1, %v1533_v24 }
 0x73b   : > { %v1501_v29 = vadd.f32 %v2740_v44, %v1500_v28  ;;  %v1527_v30 = vmax.f32 %v1509_v26, 0.0 }
 0x73d   : > { %v1525_v32 = vmax.f32 %v1501_v29, 0.0  ;;  %v1535_v35 = vpack.c.bf16 %v1527_v30, %v1526_v33  ;;  %v3979_v29 = vld [vmem:[%s4344_s3 + $0x6] ss:$0 sm:$0xff] }
 0x73f   : > { %v1534_v34 = vpack.c.bf16 %v1525_v32, %v1524_v31 }
 0x741   : > { %3158 = vmatprep.mubr.msk.bf16.mxu1 %vm677_vm1, %v1534_v34 }
 0x742   : > { %3159 = vmatmul.mubr.msk.bf16.gmra.mxu1 %vm677_vm1, %v1535_v35 }
 0x7ea   : > { %v3148_v4 = vpop.f32.mrf.mxu1 }
 0x7eb   : > { %v3892_v41 = vadd.f32 %v3148_v4, %v2751_v37 }
 0x7ec   : > { %v1610_v36 = vpop.f32.mrf.mxu1 }
 0x7ed   : > { %v3888_v39 = vadd.f32 %v2751_v37, %v1610_v36  ;;  %v4351_v49 = vmax.f32 %v3892_v41, 0.0 }
 0x7ee   : > { %v3149_v38 = vpop.f32.mrf.mxu1 }
 0x7ef   : > { %v3890_v40 = vadd.f32 %v3149_v38, %v2751_v37  ;;  %v4349_v46 = vmax.f32 %v3888_v39, 0.0 }
 0x7f0   : > { %v1613_v42 = vpop.f32.mrf.mxu1 }
 0x7f1   : > { %v3894_v43 = vadd.f32 %v2751_v37, %v1613_v42  ;;  %v4350_v44 = vmax.f32 %v3890_v40, 0.0 }
 0x7f2   : > { %v3152_v45 = vpop.f32.mrf.mxu1 }
 0x7f3   : > { %v4348_v47 = vmax.f32 %v3894_v43, 0.0  ;;  %v1695_v50 = vpack.c.bf16 %v4350_v44, %v4351_v49  ;;  %v3913_v55 = vadd.f32 %v3152_v45, %v2751_v37 }
 0x7f4   : > { %v1626_v53 = vpop.f32.mrf.mxu1 }
 0x7f5   : > { %v1694_v48 = vpack.c.bf16 %v4348_v47, %v4349_v46  ;;  %v3908_v52 = vadd.f32 %v2751_v37, %v1626_v53  ;;  %v4355_v62 = vmax.f32 %v3913_v55, 0.0 }
 0x7f6   : > { %v3153_v51 = vpop.f32.mrf.mxu1 }
 0x7f7   : > { %v3910_v54 = vadd.f32 %v3153_v51, %v2751_v37  ;;  %3166 = vmatprep.mubr.msk.bf16.mxu0 %vm677_vm1, %v1694_v48  ;;  %v4353_v60 = vmax.f32 %v3908_v52, 0.0 }
 0x7f8   : > { %v1629_v56 = vpop.f32.mrf.mxu1  ;;  %3167 = vmatmul.mubr.msk.bf16.vlgmr.msra.gmra.mxu0 %vm677_vm1, %v1695_v50 }
 0x7f9   : > { %v3916_v57 = vadd.f32 %v2751_v37, %v1629_v56  ;;  %v4354_v58 = vmax.f32 %v3910_v54, 0.0 }
 0x7fa   : > { %v3156_v59 = vpop.f32.mrf.mxu1 }
 0x7fb   : > { %v4352_v61 = vmax.f32 %v3916_v57, 0.0  ;;  %v1697_v1 = vpack.c.bf16 %v4354_v58, %v4355_v62  ;;  %v3935_v6 = vadd.f32 %v3156_v59, %v2751_v37 }
 0x7fc   : > { %v1642_v63 = vpop.f32.mrf.mxu1 }
 0x7fd   : > { %v1696_v0 = vpack.c.bf16 %v4352_v61, %v4353_v60  ;;  %v3930_v3 = vadd.f32 %v2751_v37, %v1642_v63  ;;  %v4359_v20 = vmax.f32 %v3935_v6, 0.0 }
 0x7fe   : > { %v3157_v2 = vpop.f32.mrf.mxu1 }
 0x7ff   : > { %v3932_v5 = vadd.f32 %v3157_v2, %v2751_v37  ;;  %3170 = vmatprep.mubr.msk.bf16.mxu0 %vm677_vm1, %v1696_v0  ;;  %v4357_v18 = vmax.f32 %v3930_v3, 0.0 }
 0x800   : > { %v1645_v7 = vpop.f32.mrf.mxu1  ;;  %3171 = vmatmul.mubr.msk.bf16.gmra.mxu0 %vm677_vm1, %v1697_v1 }
 0x801   : > { %v3938_v8 = vadd.f32 %v2751_v37, %v1645_v7  ;;  %v4358_v9 = vmax.f32 %v3932_v5, 0.0 }
 0x802   : > { %v3160_v10 = vpop.f32.mrf.mxu1 }
 0x803   : > { %v4356_v19 = vmax.f32 %v3938_v8, 0.0  ;;  %v1699_v11 = vpack.c.bf16 %v4358_v9, %v4359_v20  ;;  %v3957_v15 = vadd.f32 %v3160_v10, %v2751_v37 }
 0x804   : > { %v1658_v21 = vpop.f32.mrf.mxu1 }
 0x805   : > { %v1698_v22 = vpack.c.bf16 %v4356_v19, %v4357_v18  ;;  %v3952_v13 = vadd.f32 %v2751_v37, %v1658_v21  ;;  %v1687_v26 = vmax.f32 %v3957_v15, 0.0 }
 0x806   : > { %v3161_v12 = vpop.f32.mrf.mxu1 }
 0x807   : > { %v3954_v14 = vadd.f32 %v3161_v12, %v2751_v37  ;;  %3174 = vmatprep.mubr.msk.bf16.mxu0 %vm677_vm1, %v1698_v22  ;;  %v1685_v17 = vmax.f32 %v3952_v13, 0.0 }
 0x808   : > { %v1661_v23 = vpop.f32.mrf.mxu1  ;;  %3175 = vmatmul.mubr.msk.bf16.gmra.mxu0 %vm677_vm1, %v1699_v11 }
 0x809   : > { %v3960_v16 = vadd.f32 %v2751_v37, %v1661_v23  ;;  %v1688_v24 = vmax.f32 %v3954_v14, 0.0 }
 0x80b   : > { %v4360_v25 = vmax.f32 %v3960_v16, 0.0  ;;  %v1701_v28 = vpack.c.bf16 %v1688_v24, %v1687_v26  ;;  %v4367_v15 = vmax.f32 %v3960_v16, 0.0  ;;  %v4369_v16 = vmax.f32 %v3932_v5, 0.0 }
 0x80d   : > { %v1700_v27 = vpack.c.bf16 %v4360_v25, %v1685_v17 }
 0x80f   : > { %3178 = vmatprep.mubr.msk.bf16.mxu0 %vm677_vm1, %v1700_v27 }
 0x810   : > { %3179 = vmatmul.mubr.msk.bf16.gmra.mxu0 %vm677_vm1, %v1701_v28 }
 0x8b8   : > { %v3168_v30 = vpop.f32.mrf.mxu0 }
 0x8b9   : > { %v3982_v31 = vadd.f32 %v3168_v30, %v3979_v29 }
 0x8ba   : > { %v1776_v32 = vpop.f32.mrf.mxu0 }
 0x8bb   : > { %v2775_v33 = vmul.f32 -1.442695, %v3982_v31  ;;  %v3986_v34 = vadd.f32 %v3979_v29, %v1776_v32 }
 0x8bc   : > { %v3169_v35 = vpop.f32.mrf.mxu0 }
 0x8bd   : > { %3355 = vpow2.f32 %v2775_v33  ;;  %v2773_v4 = vmul.f32 -1.442695, %v3986_v34  ;;  %v3990_v36 = vadd.f32 %v3169_v35, %v3979_v29 }
 0x8be   : > { %v1779_v37 = vpop.f32.mrf.mxu0 }
 0x8bf   : > { %3357 = vpow2.f32 %v2773_v4  ;;  %v2776_v38 = vmul.f32 -1.442695, %v3990_v36  ;;  %v3994_v42 = vadd.f32 %v3979_v29, %v1779_v37 }
 0x8c0   : > { %v3172_v45 = vpop.f32.mrf.mxu0 }
 0x8c1   : > { %3359 = vpow2.f32 %v2776_v38  ;;  %v2774_v53 = vmul.f32 -1.442695, %v3994_v42  ;;  %v3998_v48 = vadd.f32 %v3172_v45, %v3979_v29 }
 0x8c2   : > { %v1792_v50 = vpop.f32.mrf.mxu0 }
 0x8c3   : > { %3361 = vpow2.f32 %v2774_v53  ;;  %v2779_v51 = vmul.f32 -1.442695, %v3998_v48  ;;  %v4002_v56 = vadd.f32 %v3979_v29, %v1792_v50 }
 0x8c4   : > { %v3173_v59 = vpop.f32.mrf.mxu0 }
 0x8c5   : > { %3363 = vpow2.f32 %v2779_v51  ;;  %v2777_v63 = vmul.f32 -1.442695, %v4002_v56  ;;  %v4006_v0 = vadd.f32 %v3173_v59, %v3979_v29 }
 0x8c6   : > { %v1795_v1 = vpop.f32.mrf.mxu0 }
 0x8c7   : > { %3365 = vpow2.f32 %v2777_v63  ;;  %v2780_v2 = vmul.f32 -1.442695, %v4006_v0  ;;  %v4010_v7 = vadd.f32 %v3979_v29, %v1795_v1 }
 0x8c8   : > { %v3176_v10 = vpop.f32.mrf.mxu0 }
 0x8c9   : > { %3367 = vpow2.f32 %v2780_v2  ;;  %v2778_v21 = vmul.f32 -1.442695, %v4010_v7  ;;  %v4014_v22 = vadd.f32 %v3176_v10, %v3979_v29 }
 0x8ca   : > { %v3356_v11 = vpop.eup %3355  ;;  %v1808_v12 = vpop.f32.mrf.mxu0 }
 0x8cb   : > { %v1905_v23 = vadd.f32 1.0, %v3356_v11  ;;  %3369 = vpow2.f32 %v2778_v21  ;;  %v2783_v27 = vmul.f32 -1.442695, %v4014_v22  ;;  %v4018_v28 = vadd.f32 %v3979_v29, %v1808_v12 }
 0x8cc   : > { %v3358_v30 = vpop.eup %3357  ;;  %v3177_v32 = vpop.f32.mrf.mxu0 }
 0x8cd   : > { %3371 = vrcp.f32 %v1905_v23  ;;  %v1903_v33 = vadd.f32 1.0, %v3358_v30  ;;  %v2781_v4 = vmul.f32 -1.442695, %v4018_v28  ;;  %v4022_v37 = vadd.f32 %v3177_v32, %v3979_v29 }
 0x8ce   : > { %v3360_v35 = vpop.eup %3359  ;;  %3373 = vpow2.f32 %v2783_v27  ;;  %v1811_v38 = vpop.f32.mrf.mxu0 }
 0x8cf   : > { %3375 = vrcp.f32 %v1903_v33  ;;  %v1906_v45 = vadd.f32 1.0, %v3360_v35  ;;  %v2784_v63 = vmul.f32 -1.442695, %v4022_v37  ;;  %v4026_v1 = vadd.f32 %v3979_v29, %v1811_v38 }
 0x8d0   : > { %v3362_v53 = vpop.eup %3361  ;;  %v3180_v50 = vpop.f32.mrf.mxu0 }
 0x8d1   : > { %3377 = vrcp.f32 %v1906_v45  ;;  %v1904_v51 = vadd.f32 1.0, %v3362_v53  ;;  %v2782_v12 = vmul.f32 -1.442695, %v4026_v1  ;;  %v4030_v23 = vadd.f32 %v3180_v50, %v3979_v29 }
 0x8d2   : > { %v3364_v59 = vpop.eup %3363  ;;  %3379 = vpow2.f32 %v2781_v4  ;;  %v1824_v2 = vpop.f32.mrf.mxu0 }
 0x8d3   : > { %3381 = vrcp.f32 %v1904_v51  ;;  %v1909_v10 = vadd.f32 1.0, %v3364_v59  ;;  %v4033_v35 = vadd.f32 %v3979_v29, %v1824_v2  ;;  %v2787_v45 = vmul.f32 -1.442695, %v4030_v23 }
 0x8d4   : > { %v3366_v21 = vpop.eup %3365  ;;  %3383 = vpow2.f32 %v2784_v63  ;;  %v3181_v27 = vpop.f32.mrf.mxu0 }
 0x8d5   : > { %3385 = vrcp.f32 %v1909_v10  ;;  %v1907_v30 = vadd.f32 1.0, %v3366_v21  ;;  %v2785_v63 = vmul.f32 -1.442695, %v4033_v35  ;;  %v4039_v10 = vadd.f32 %v3181_v27, %v3979_v29 }
 0x8d6   : > { %v3368_v11 = vpop.eup %3367  ;;  %v1827_v53 = vpop.f32.mrf.mxu0 }
 0x8d7   : > { %v1910_v32 = vadd.f32 1.0, %v3368_v11  ;;  %v4042_v2 = vadd.f32 %v3979_v29, %v1827_v53 }
 0x8d8   : > { %v3370_v33 = vpop.eup %3369 }
 0x8d9   : > { %3387 = vrcp.f32 %v1910_v32  ;;  %v1908_v4 = vadd.f32 1.0, %v3370_v33  ;;  %v2788_v32 = vmul.f32 -1.442695, %v4039_v10  ;;  %v2786_v27 = vmul.f32 -1.442695, %v4042_v2 }
 0x8da   : > { %v3372_v38 = vpop.eup %3371  ;;  %3389 = vpow2.f32 %v2782_v12 }
 0x8db   : > { %v3374_v51 = vpop.eup %3373  ;;  %3391 = vrcp.f32 %v1907_v30  ;;  %1971 = vrot.lane.b32.xlu1 %v3372_v38, %s3582_s12 }
 0x8dc   : > { %v3376_v50 = vpop.eup %3375  ;;  %v1913_v59 = vadd.f32 1.0, %v3374_v51  ;;  %3393 = vrcp.f32 %v1908_v4 }
 0x8dd   : > { %1967 = vrot.lane.b32.xlu0 %v3376_v50, %s3582_s12  ;;  %3395 = vpow2.f32 %v2787_v45 }
 0x8de   : > { %v3378_v21 = vpop.eup %3377  ;;  %3397 = vrcp.f32 %v1913_v59 }
 0x8df   : > { %v3380_v11 = vpop.eup %3379  ;;  %1973 = vrot.lane.b32.xlu1 %v3378_v21, %s3582_s12  ;;  %3399 = vpow2.f32 %v2785_v63 }
 0x8e0   : > { %v3382_v12 = vpop.eup %3381  ;;  %v1911_v30 = vadd.f32 1.0, %v3380_v11 }
 0x8e1   : > { %1969 = vrot.lane.b32.xlu0 %v3382_v12, %s3582_s12  ;;  %v3384_v33 = vpop.eup %3383 }
 0x8e2   : > { %3401 = vrcp.f32 %v1911_v30  ;;  %v3386_v29 = vpop.eup %3385  ;;  %v1914_v4 = vadd.f32 1.0, %v3384_v33 }
 0x8e3   : > { %3403 = vpow2.f32 %v2788_v32 }
 0x8e4   : > { %3405 = vpow2.f32 %v2786_v27 }
 0x8e5   : > { %1979 = vrot.lane.b32.xlu0 %v3386_v29, %s3582_s12  ;;  %3407 = vrcp.f32 %v1914_v4 }
 0x8e6   : > { %v3388_v38 = vpop.eup %3387 }
 0x8e7   : > { %v3390_v45 = vpop.eup %3389  ;;  %1981 = vrot.lane.b32.xlu1 %v3388_v38, %s3582_s12 }
 0x8e8   : > { %v3392_v53 = vpop.eup %3391  ;;  %v1912_v51 = vadd.f32 1.0, %v3390_v45 }
 0x8e9   : > { %1975 = vrot.lane.b32.xlu0 %v3392_v53, %s3582_s12  ;;  %v3394_v50 = vpop.eup %3393 }
 0x8ea   : > { %3409 = vrcp.f32 %v1912_v51  ;;  %v3396_v59 = vpop.eup %3395 }
 0x8eb   : > { %1977 = vrot.lane.b32.xlu1 %v3394_v50, %s3582_s12  ;;  %v3398_v63 = vpop.eup %3397  ;;  %v1917_v30 = vadd.f32 1.0, %v3396_v59 }
 0x8ec   : > { %v3400_v21 = vpop.eup %3399 }
 0x8ed   : > { %1987 = vrot.lane.b32.xlu0 %v3398_v63, %s3582_s12  ;;  %v1915_v11 = vadd.f32 1.0, %v3400_v21  ;;  %v4070_v21 = vld [vmem:[%s4344_s3 + $0x8] ss:$0 sm:$0xff] }
 0x8ef   : > { %v3402_v12 = vpop.eup %3401  ;;  %3411 = vrcp.f32 %v1915_v11 }
 0x8f0   : > { %v3404_v32 = vpop.eup %3403  ;;  %3413 = vrcp.f32 %v1917_v30 }
 0x8f1   : > { %1983 = vrot.lane.b32.xlu0 %v3402_v12, %s3582_s12  ;;  %v3406_v27 = vpop.eup %3405  ;;  %v1918_v4 = vadd.f32 1.0, %v3404_v32 }
 0x8f2   : > { %v3408_v33 = vpop.eup %3407  ;;  %v1916_v29 = vadd.f32 1.0, %v3406_v27 }
 0x8f3   : > { %1989 = vrot.lane.b32.xlu1 %v3408_v33, %s3582_s12 }
 0x8f4   : > { %3415 = vrcp.f32 %v1916_v29 }
 0x8f5   : > { %3417 = vrcp.f32 %v1918_v4 }
 0x8f6   : > { %3419 = vtanh.f32 %v3982_v31 }
 0x8f7   : > { %v3410_v38 = vpop.eup %3409  ;;  %3421 = vtanh.f32 %v3986_v34 }
 0x8f8   : > { %1985 = vrot.lane.b32.xlu1 %v3410_v38, %s3582_s12  ;;  %3423 = vtanh.f32 %v3990_v36 }
 0x8f9   : > { %3425 = vtanh.f32 %v3994_v42 }
 0x8fa   : > { %3427 = vtanh.f32 %v3998_v48 }
 0x8fb   : > { %3429 = vtanh.f32 %v4006_v0 }
 0x8fc   : > { %v3412_v45 = vpop.eup %3411  ;;  %3431 = vtanh.f32 %v4002_v56 }
 0x8fd   : > { %1991 = vrot.lane.b32.xlu0 %v3412_v45, %s3582_s12  ;;  %v3414_v53 = vpop.eup %3413  ;;  %3433 = vtanh.f32 %v4010_v7 }
 0x8fe   : > { %3435 = vtanh.f32 %v4014_v22 }
 0x8ff   : > { %3437 = vtanh.f32 %v4018_v28 }
 0x900   : > { %3439 = vtanh.f32 %v4022_v37 }
 0x901   : > { %v3416_v51 = vpop.eup %3415  ;;  %1995 = vrot.lane.b32.xlu0 %v3414_v53, %s3582_s12  ;;  %3441 = vtanh.f32 %v4026_v1 }
 0x902   : > { %1993 = vrot.lane.b32.xlu1 %v3416_v51, %s3582_s12  ;;  %v3418_v50 = vpop.eup %3417  ;;  %3443 = vtanh.f32 %v4033_v35 }
 0x903   : > { %v3420_v59 = vpop.eup %3419  ;;  %3445 = vtanh.f32 %v4030_v23 }
 0x904   : > { %v3422_v11 = vpop.eup %3421  ;;  %3447 = vtanh.f32 %v4042_v2 }
 0x905   : > { %v3424_v48 = vpop.eup %3423  ;;  %3449 = vtanh.f32 %v4039_v10 }
 0x906   : > { %1997 = vrot.lane.b32.xlu1 %v3418_v50, %s3582_s12  ;;  %v3426_v27 = vpop.eup %3425 }
 0x907   : > { %v3428_v38 = vpop.eup %3427 }
 0x908   : > { %v3430_v51 = vpop.eup %3429 }
 0x94d   : > { %v1972_v63 = vpop.permute.xlu1 %1971 }
 0x94e   : > { %v2017_v31 = vmul.f32 %v3420_v59, %v1972_v63 }
 0x94f   : > { %v1968_v34 = vpop.permute.xlu0 %1967 }
 0x950   : > { %v2015_v36 = vmul.f32 %v3422_v11, %v1968_v34  ;;  %v2039_v42 = vmul.f32 %v4070_v21, %v2017_v31  ;;  %v3432_v31 = vpop.eup %3431 }
 0x951   : > { %v1974_v12 = vpop.permute.xlu1 %1973 }
 0x952   : > { %v2018_v0 = vmul.f32 %v3424_v48, %v1974_v12  ;;  %v2059_v30 = vsel %vm677_vm1, %v2039_v42, 0.0  ;;  %v2037_v32 = vmul.f32 %v4070_v21, %v2015_v36  ;;  %v3434_v48 = vpop.eup %3433 }
 0x953   : > { %v1970_v33 = vpop.permute.xlu0 %1969  ;;  %2060 = vadd.xlane.f32.xlu0 %v2059_v30 }
 0x954   : > { %v2016_v56 = vmul.f32 %v3426_v27, %v1970_v33  ;;  %v2053_v7 = vsel %vm677_vm1, %v2037_v32, 0.0  ;;  %v2040_v4 = vmul.f32 %v4070_v21, %v2018_v0  ;;  %v3436_v32 = vpop.eup %3435 }
 0x956   : > { %v2038_v29 = vmul.f32 %v4070_v21, %v2016_v56  ;;  %v2062_v28 = vsel %vm677_vm1, %v2040_v4, 0.0  ;;  %v3438_v4 = vpop.eup %3437 }
 0x957   : > { %v1980_v45 = vpop.permute.xlu0 %1979  ;;  %2054 = vadd.xlane.f32.xlu0 %v2053_v7 }
 0x958   : > { %v2021_v22 = vmul.f32 %v3428_v38, %v1980_v45  ;;  %v2056_v53 = vsel %vm677_vm1, %v2038_v29, 0.0 }
 0x959   : > { %v1982_v50 = vpop.permute.xlu1 %1981  ;;  %2057 = vadd.xlane.f32.xlu1 %v2056_v53  ;;  %v3440_v53 = vpop.eup %3439 }
 0x95a   : > { %v2022_v59 = vmul.f32 %v3430_v51, %v1982_v50  ;;  %v2043_v63 = vmul.f32 %v4070_v21, %v2021_v22  ;;  %v3442_v35 = vpop.eup %3441 }
 0x95b   : > { %v1976_v11 = vpop.permute.xlu0 %1975  ;;  %2063 = vadd.xlane.f32.xlu0 %v2062_v28 }
 0x95c   : > { %v2019_v34 = vmul.f32 %v3432_v31, %v1976_v11  ;;  %v2071_v36 = vsel %vm677_vm1, %v2043_v63, 0.0  ;;  %v2044_v42 = vmul.f32 %v4070_v21, %v2022_v59 }
 0x95d   : > { %v1978_v12 = vpop.permute.xlu1 %1977  ;;  %2072 = vadd.xlane.f32.xlu1 %v2071_v36 }
 0x95e   : > { %v2020_v37 = vmul.f32 %v3434_v48, %v1978_v12  ;;  %v2074_v0 = vsel %vm677_vm1, %v2044_v42, 0.0  ;;  %v2041_v30 = vmul.f32 %v4070_v21, %v2019_v34  ;;  %v3444_v42 = vpop.eup %3443 }
 0x95f   : > { %v1988_v27 = vpop.permute.xlu0 %1987  ;;  %2075 = vadd.xlane.f32.xlu0 %v2074_v0 }
 0x960   : > { %v2025_v33 = vmul.f32 %v3436_v32, %v1988_v27  ;;  %v2065_v56 = vsel %vm677_vm1, %v2041_v30, 0.0  ;;  %v2042_v7 = vmul.f32 %v4070_v21, %v2020_v37  ;;  %v3446_v37 = vpop.eup %3445 }
 0x961   : > { %2066 = vadd.xlane.f32.xlu1 %v2065_v56  ;;  %v3448_v30 = vpop.eup %3447 }
 0x962   : > { %v2068_v29 = vsel %vm677_vm1, %v2042_v7, 0.0  ;;  %v2047_v1 = vmul.f32 %v4070_v21, %v2025_v33 }
 0x963   : > { %v1984_v38 = vpop.permute.xlu0 %1983  ;;  %2069 = vadd.xlane.f32.xlu0 %v2068_v29  ;;  %v3450_v29 = vpop.eup %3449 }
 0x964   : > { %v2023_v45 = vmul.f32 %v3438_v4, %v1984_v38  ;;  %v2083_v22 = vsel %vm677_vm1, %v2047_v1, 0.0 }
 0x965   : > { %2084 = vadd.xlane.f32.xlu1 %v2083_v22  ;;  %v1990_v51 = vpop.permute.xlu1 %1989 }
 0x966   : > { %v2045_v50 = vmul.f32 %v4070_v21, %v2023_v45  ;;  %v2026_v59 = vmul.f32 %v3440_v53, %v1990_v51 }
 0x968   : > { %v2077_v28 = vsel %vm677_vm1, %v2045_v50, 0.0  ;;  %v2048_v63 = vmul.f32 %v4070_v21, %v2026_v59 }
 0x969   : > { %2078 = vadd.xlane.f32.xlu1 %v2077_v28 }
 0x96a   : > { %v1986_v31 = vpop.permute.xlu1 %1985  ;;  %v2086_v34 = vsel %vm677_vm1, %v2048_v63, 0.0 }
 0x96b   : > { %v2024_v11 = vmul.f32 %v3442_v35, %v1986_v31  ;;  %2087 = vadd.xlane.f32.xlu0 %v2086_v34 }
 0x96d   : > { %v2046_v36 = vmul.f32 %v4070_v21, %v2024_v11 }
 0x96f   : > { %v2080_v23 = vsel %vm677_vm1, %v2046_v36, 0.0  ;;  %v1992_v48 = vpop.permute.xlu0 %1991 }
 0x970   : > { %2081 = vadd.xlane.f32.xlu0 %v2080_v23  ;;  %v2027_v2 = vmul.f32 %v3444_v42, %v1992_v48  ;;  %v2790_v42 = vld [vmem:[%s4344_s3 + $0x9] ss:$0 sm:$0xff] }
 0x972   : > { %v2049_v12 = vmul.f32 %v4070_v21, %v2027_v2 }
 0x973   : > { %v1996_v0 = vpop.permute.xlu0 %1995 }
 0x974   : > { %v1994_v32 = vpop.permute.xlu1 %1993  ;;  %v2029_v27 = vmul.f32 %v3446_v37, %v1996_v0  ;;  %v2089_v33 = vsel %vm677_vm1, %v2049_v12, 0.0 }
 0x975   : > { %v2028_v56 = vmul.f32 %v3448_v30, %v1994_v32  ;;  %2090 = vadd.xlane.f32.xlu1 %v2089_v33 }
 0x976   : > { %v2051_v10 = vmul.f32 %v4070_v21, %v2029_v27 }
 0x977   : > { %v2050_v7 = vmul.f32 %v4070_v21, %v2028_v56 }
 0x978   : > { %v1998_v1 = vpop.permute.xlu1 %1997  ;;  %v2095_v4 = vsel %vm677_vm1, %v2051_v10, 0.0 }
 0x979   : > { %v2030_v38 = vmul.f32 %v3450_v29, %v1998_v1  ;;  %v2092_v45 = vsel %vm677_vm1, %v2050_v7, 0.0  ;;  %2096 = vadd.xlane.f32.xlu1 %v2095_v4 }
 0x97a   : > { %2093 = vadd.xlane.f32.xlu0 %v2092_v45 }
 0x97b   : > { %v2052_v22 = vmul.f32 %v4070_v21, %v2030_v38 }
 0x97d   : > { %v2098_v53 = vsel %vm677_vm1, %v2052_v22, 0.0 }
 0x97e   : > { %2099 = vadd.xlane.f32.xlu0 %v2098_v53 }
 0x9dc   : > { %v2061_v51 = vpop.xlane.xlu0 %2060 }
 0x9dd   : > { %v4129_v27 = vadd.f32 %v2790_v42, %v2061_v51 }
 0x9e0   : > { %v2055_v50 = vpop.xlane.xlu0 %2054 }
 0x9e1   : > { %v4131_v33 = vadd.f32 %v2790_v42, %v2055_v50 }
 0x9e2   : > { %v2058_v59 = vpop.xlane.xlu1 %2057 }
 0x9e3   : > { %v4119_v12 = vadd.f32 %v2790_v42, %v2058_v59 }
 0x9e4   : > { %v2064_v28 = vpop.xlane.xlu0 %2063 }
 0x9e5   : > { %v4133_v56 = vadd.f32 %v2790_v42, %v2064_v28  ;;  %v2123_v38 = vsel %vm2121_vm2, %v4119_v12, -inf }
 0x9e6   : > { %v2073_v63 = vpop.xlane.xlu1 %2072 }
 0x9e7   : > { %v4121_v37 = vadd.f32 %v2790_v42, %v2073_v63 }
 0x9e8   : > { %v2076_v35 = vpop.xlane.xlu0 %2075 }
 0x9e9   : > { %v4123_v0 = vadd.f32 %v2790_v42, %v2076_v35  ;;  %v2130_v45 = vsel %vm2121_vm2, %v4121_v37, -inf  ;;  %v2124_v35 = vsel %vm2121_vm2, %v4129_v27, -inf }
 0x9ea   : > { %v2067_v31 = vpop.xlane.xlu1 %2066 }
 0x9eb   : > { %v4125_v30 = vadd.f32 %v2790_v42, %v2067_v31  ;;  %v2132_v22 = vsel %vm2121_vm2, %v4123_v0, -inf  ;;  %v2122_v31 = vsel %vm2121_vm2, %v4131_v33, -inf }
 0x9ec   : > { %v2070_v11 = vpop.xlane.xlu0 %2069 }
 0x9ed   : > { %v4117_v21 = vadd.f32 %v2790_v42, %v2070_v11  ;;  %v2126_v53 = vsel %vm2121_vm2, %v4125_v30, -inf  ;;  %v2125_v11 = vsel %vm2121_vm2, %v4133_v56, -inf }
 0x9ee   : > { %v2085_v34 = vpop.xlane.xlu1 %2084  ;;  %v2127_v47 = vmax.f32 %v2122_v31, %v2126_v53  ;;  %v3583_v53 = vmov 0  }
 0x9ef   : > { %v2128_v10 = vsel %vm2121_vm2, %v4117_v21, -inf  ;;  %v4137_v7 = vadd.f32 %v2790_v42, %v2085_v34  ;;  %3276 = vset.pattern.permute.xlu1 %v3583_v53  ;;  %3275 = vset.pattern.permute.xlu0 %v3583_v53 }
 0x9f0   : > { %v2129_v34 = vmax.f32 %v2123_v38, %v2128_v10 }
 0x9f2   : > { %v2079_v23 = vpop.xlane.xlu1 %2078 }
 0x9f3   : > { %v4141_v1 = vadd.f32 %v2790_v42, %v2079_v23 }
 0x9f4   : > { %v2088_v36 = vpop.xlane.xlu0 %2087 }
 0x9f5   : > { %v4139_v29 = vadd.f32 %v2790_v42, %v2088_v36  ;;  %v2138_v36 = vsel %vm2121_vm2, %v4137_v7, -inf }
 0x9f7   : > { %v2140_v23 = vsel %vm2121_vm2, %v4139_v29, -inf }
 0x9f9   : > { %v2082_v48 = vpop.xlane.xlu0 %2081 }
 0x9fa   : > { %v4127_v32 = vadd.f32 %v2790_v42, %v2082_v48  ;;  %v2134_v48 = vsel %vm2121_vm2, %v4141_v1, -inf }
 0x9fb   : > { %v2135_v58 = vmax.f32 %v2127_v47, %v2134_v48 }
 0x9fc   : > { %v2136_v50 = vsel %vm2121_vm2, %v4127_v32, -inf }
 0x9fd   : > { %v2137_v46 = vmax.f32 %v2129_v34, %v2136_v50 }
 0x9fe   : > { %v2091_v2 = vpop.xlane.xlu1 %2090 }
 0x9ff   : > { %v2117_v59 = vadd.f32 %v2790_v42, %v2091_v2 }
 0xa01   : > { %v2142_v49 = vsel %vm2121_vm2, %v2117_v59, -inf }
 0xa02   : > { %v2097_v4 = vpop.xlane.xlu1 %2096  ;;  %v2143_v18 = vmax.f32 %v2135_v58, %v2142_v49 }
 0xa03   : > { %v2094_v51 = vpop.xlane.xlu0 %2093  ;;  %v2119_v63 = vadd.f32 %v2790_v42, %v2097_v4  ;;  %v2131_v4 = vmax.f32 %v2124_v35, %v2130_v45 }
 0xa04   : > { %v2118_v28 = vadd.f32 %v2790_v42, %v2094_v51  ;;  %v2133_v51 = vmax.f32 %v2125_v11, %v2132_v22 }
 0xa05   : > { %v2146_v10 = vsel %vm2121_vm2, %v2119_v63, -inf  ;;  %v2139_v61 = vmax.f32 %v2131_v4, %v2138_v36 }
 0xa06   : > { %v2144_v2 = vsel %vm2121_vm2, %v2118_v28, -inf  ;;  %v2141_v60 = vmax.f32 %v2133_v51, %v2140_v23 }
 0xa07   : > { %v2100_v44 = vpop.xlane.xlu0 %2099  ;;  %v2145_v62 = vmax.f32 %v2137_v46, %v2144_v2  ;;  %v2147_v9 = vmax.f32 %v2139_v61, %v2146_v10 }
 0xa08   : > { %v2120_v38 = vadd.f32 %v2790_v42, %v2100_v44 }
 0xa09   : > { %v2150_v25 = vmax.f32 %v2143_v18, %v2145_v62 }
 0xa0a   : > { %v2148_v19 = vsel %vm2121_vm2, %v2120_v38, -inf }
 0xa0b   : > { %v2149_v20 = vmax.f32 %v2141_v60, %v2148_v19 }
 0xa0d   : > { %v2151_v45 = vmax.f32 %v2147_v9, %v2149_v20 }
 0xa0f   : > { %v2152_v22 = vmax.f32 %v2150_v25, %v2151_v45 }
 0xa11   : > { %2153 = vmax.xlane.f32.xlu1 %v2152_v22 }
 0xa9a   : > { %v2154_v50 = vpop.xlane.xlu1 %2153 }
 0xa9b   : > { %v2155_v35 = vrot.slane %v2154_v50, 4 }
 0xa9d   : > { %v2156_v31 = vmax.f32 %v2154_v50, %v2155_v35 }
 0xa9f   : > { %v2157_v44 = vrot.slane %v2156_v31, 2 }
 0xaa1   : > { %v2158_v42 = vmax.f32 %v2156_v31, %v2157_v44 }
 0xaa3   : > { %v2159_v11 = vrot.slane %v2158_v42, 1 }
 0xaa5   : > { %v2160_v47 = vmax.f32 %v2158_v42, %v2159_v11  ;;  %v3585_v42 = vmov 0.0  }
 0xaa6   : > { %3182 = vmatprep.subr.bf16.mxu1 %v3585_v42  ;;  %3210 = vmatprep.subr.bf16.mxu0 %v3585_v42 }
 0xaa7   : > { %3218 = vpush %v2160_v47  ;;  %3198 = vmatprep.mubr.msk.bf16.mxu1 %vm3586_vm3, %v3585_v42  ;;  %3214 = vmatprep.mubr.msk.bf16.mxu0 %vm3586_vm3, %v3585_v42 }
 0xad8   : > { %s3219_s30 = spop %3218 }
 0xad9   : > { %v4169_v46 = vstv %s3219_s30  ;;  %s231_s30 = scalar_lea.vmem [#allocation5], %s2675_s23 }
 0xada   : > { %v2178_v49 = vsub.f32 %v2120_v38, %v4169_v46  ;;  %v2177_v58 = vsub.f32 %v2119_v63, %v4169_v46  ;;  %v2175_v60 = vsub.f32 %v2117_v59, %v4169_v46  ;;  %v2172_v61 = vsub.f32 %v4127_v32, %v4169_v46 }
 0xadb   : > { %v2176_v18 = vsub.f32 %v2118_v28, %v4169_v46  ;;  %v2169_v20 = vsub.f32 %v4121_v37, %v4169_v46  ;;  %v2171_v34 = vsub.f32 %v4141_v1, %v4169_v46  ;;  %v2173_v32 = vsub.f32 %v4137_v7, %v4169_v46 }
 0xadc   : > { %v2209_v62 = vmul.f32 1.442695, %v2178_v49  ;;  %v2207_v9 = vmul.f32 1.442695, %v2177_v58  ;;  %v2203_v19 = vmul.f32 1.442695, %v2175_v60  ;;  %v2168_v28 = vsub.f32 %v4117_v21, %v4169_v46 }
 0xadd   : > { %v2197_v25 = vmul.f32 1.442695, %v2172_v61  ;;  %v2205_v63 = vmul.f32 1.442695, %v2176_v18  ;;  %v2191_v59 = vmul.f32 1.442695, %v2169_v20  ;;  %v2174_v37 = vsub.f32 %v4139_v29, %v4169_v46 }
 0xade   : > { %3451 = vpow2.f32 %v2209_v62  ;;  %v2195_v36 = vmul.f32 1.442695, %v2171_v34  ;;  %v2199_v23 = vmul.f32 1.442695, %v2173_v32  ;;  %v2165_v1 = vsub.f32 %v4129_v27, %v4169_v46 }
 0xadf   : > { %3453 = vpow2.f32 %v2207_v9  ;;  %v2189_v2 = vmul.f32 1.442695, %v2168_v28  ;;  %v2167_v4 = vsub.f32 %v4125_v30, %v4169_v46  ;;  %v2201_v7 = vmul.f32 1.442695, %v2174_v37 }
 0xae0   : > { %3455 = vpow2.f32 %v2203_v19  ;;  %v2183_v10 = vmul.f32 1.442695, %v2165_v1  ;;  %v2164_v27 = vsub.f32 %v4119_v12, %v4169_v46  ;;  %v2163_v30 = vsub.f32 %v4131_v33, %v4169_v46 }
 0xae1   : > { %3457 = vpow2.f32 %v2197_v25  ;;  %v2187_v21 = vmul.f32 1.442695, %v2167_v4  ;;  %v2170_v12 = vsub.f32 %v4123_v0, %v4169_v46  ;;  %v2166_v0 = vsub.f32 %v4133_v56, %v4169_v46 }
 0xae2   : > { %3459 = vpow2.f32 %v2205_v63  ;;  %v2181_v35 = vmul.f32 1.442695, %v2164_v27  ;;  %v2179_v44 = vmul.f32 1.442695, %v2163_v30 }
 0xae3   : > { %3461 = vpow2.f32 %v2191_v59  ;;  %v2193_v49 = vmul.f32 1.442695, %v2170_v12  ;;  %v2185_v20 = vmul.f32 1.442695, %v2166_v0 }
 0xae4   : > { %3463 = vpow2.f32 %v2195_v36 }
 0xae5   : > { %3465 = vpow2.f32 %v2199_v23 }
 0xae6   : > { %3467 = vpow2.f32 %v2189_v2 }
 0xae7   : > { %3469 = vpow2.f32 %v2201_v7 }
 0xae8   : > { %3471 = vpow2.f32 %v2183_v10 }
 0xae9   : > { %3473 = vpow2.f32 %v2187_v21 }
 0xaea   : > { %3475 = vpow2.f32 %v2181_v35 }
 0xaeb   : > { %v3452_v48 = vpop.eup %3451  ;;  %3477 = vpow2.f32 %v2179_v44 }
 0xaec   : > { %v3454_v51 = vpop.eup %3453  ;;  %2301 = vperm.xlu1 %3276, %v3452_v48   ;;  %3479 = vpow2.f32 %v2193_v49 }
 0xaed   : > { %2296 = vperm.xlu0 %3275, %v3454_v51   ;;  %v3456_v38 = vpop.eup %3455  ;;  %v3277_v50 = vpack.i.bf16 %v3452_v48, %v3454_v51  ;;  %3481 = vpow2.f32 %v2185_v20 }
 0xaee   : > { %v3458_v45 = vpop.eup %3457 }
 0xaef   : > { %v3460_v29 = vpop.eup %3459 }
 0xaf0   : > { %2286 = vperm.xlu1 %3276, %v3456_v38   ;;  %v3462_v22 = vpop.eup %3461  ;;  %v3282_v61 = vpack.i.bf16 %v3460_v29, %v3456_v38 }
 0xaf1   : > { %2271 = vperm.xlu0 %3275, %v3458_v45   ;;  %v3464_v53 = vpop.eup %3463 }
 0xaf2   : > { %v3292_v31 = vpack.i.bf16 %v3458_v45, %v3464_v53  ;;  %v3466_v33 = vpop.eup %3465 }
 0xaf3   : > { %v3468_v11 = vpop.eup %3467 }
 0xaf4   : > { %2291 = vperm.xlu1 %3276, %v3460_v29   ;;  %v3470_v47 = vpop.eup %3469 }
 0xaf5   : > { %2256 = vperm.xlu0 %3275, %v3462_v22   ;;  %v3472_v58 = vpop.eup %3471  ;;  %v3287_v19 = vpack.i.bf16 %v3470_v47, %v3466_v33 }
 0xaf6   : > { %v3474_v60 = vpop.eup %3473 }
 0xaf7   : > { %v3302_v62 = vpack.i.bf16 %v3468_v11, %v3474_v60  ;;  %v3476_v9 = vpop.eup %3475 }
 0xaf8   : > { %3278 = vrot.lane.b32.xlu1 %v3277_v50, %s3584_s5  ;;  %v3478_v18 = vpop.eup %3477 }
 0xaf9   : > { %3293 = vrot.lane.b32.xlu0 %v3292_v31, %s3584_s5  ;;  %v3312_v25 = vpack.i.bf16 %v3476_v9, %v3478_v18  ;;  %v3480_v34 = vpop.eup %3479  ;;  %v4368_v31 = vmax.f32 %v3935_v6, 0.0  ;;  %v4371_v6 = vmax.f32 %v3938_v8, 0.0  ;;  %v2211_v8 = vlaneseq }
 0xafa   : > { %v3297_v63 = vpack.i.bf16 %v3480_v34, %v3462_v22  ;;  %v3482_v59 = vpop.eup %3481 }
 0xafb   : > { %v3307_v56 = vpack.i.bf16 %v3482_v59, %v3472_v58 }
 0xafc   : > { %2276 = vperm.xlu1 %3276, %v3466_v33   ;;  %v4370_v33 = vmax.f32 %v3930_v3, 0.0 }
 0xafd   : > { %2251 = vperm.xlu0 %3275, %v3468_v11  }
 0xb00   : > { %2281 = vperm.xlu1 %3276, %v3470_v47  }
 0xb01   : > { %2236 = vperm.xlu0 %3275, %v3472_v58  }
 0xb04   : > { %3283 = vrot.lane.b32.xlu1 %v3282_v61, %s3584_s5 }
 0xb05   : > { %3303 = vrot.lane.b32.xlu0 %v3302_v62, %s3584_s5 }
 0xb08   : > { %2266 = vperm.xlu1 %3276, %v3464_v53  }
 0xb09   : > { %2231 = vperm.xlu0 %3275, %v3476_v9  }
 0xb0c   : > { %3288 = vrot.lane.b32.xlu1 %v3287_v19, %s3584_s5 }
 0xb0d   : > { %3313 = vrot.lane.b32.xlu0 %v3312_v25, %s3584_s5 }
 0xb10   : > { %2261 = vperm.xlu1 %3276, %v3480_v34   ;;  %v4372_v34 = vmax.f32 %v3913_v55, 0.0 }
 0xb14   : > { %2246 = vperm.xlu1 %3276, %v3474_v60  }
 0xb18   : > { %3298 = vrot.lane.b32.xlu1 %v3297_v63, %s3584_s5 }
 0xb1c   : > { %2241 = vperm.xlu1 %3276, %v3482_v59  }
 0xb20   : > { %2226 = vperm.xlu1 %3276, %v3478_v18  }
 0xb24   : > { %3308 = vrot.lane.b32.xlu1 %v3307_v56, %s3584_s5  ;;  %s2585_s5 = sshll.u32 %s231_s30, 4  ;;  %s4300_s5 = int_to_ptr.vmem [resolvable:$true] %s2585_s5 }
 0xb25   : > { %s3513_s20 = scalar_lea.vmem %s4300_s5, 128  ;;  %p3520_p7 = scmp.lt.s32.totalorder %s4300_s5, %s3518_s22 }
 0xb26   : > { %p3514_p12 = scmp.ne.s32.totalorder %s4300_s5, %s3513_s20  ;;  %p3521_p8 = scmp.lt.s32.totalorder %s3519_s8, %s3513_s20 }
 0xb28   : > { %p3515_p4 = pnand %p3514_p12, %p4380_p13  ;;  %p3522_p10 = por %p3521_p8, %p3520_p7 }
 0xb2a   : > { %p3516_p5 = pneg %p3515_p4 }
 0xb2c   : > { %p3523_p0 = pnand %p3522_p10, %p3516_p5 }
 0xb67   : > { %v2302_v46 = vpop.permute.xlu1 %2301 }
 0xb68   : > { %v2297_v32 = vpop.permute.xlu0 %2296  ;;  %v2319_v23 = vmul.f32 %v2302_v46, %v1688_v24  ;;  %v4373_v46 = vmax.f32 %v3910_v54, 0.0 }
 0xb69   : > { %v2318_v1 = vmul.f32 %v2297_v32, %v1687_v26  ;;  %v4374_v32 = vmax.f32 %v3908_v52, 0.0 }
 0xb6b   : > { %v2287_v36 = vpop.permute.xlu1 %2286 }
 0xb6c   : > { %v2272_v4 = vpop.permute.xlu0 %2271  ;;  %v2316_v14 = vmul.f32 %v2287_v36, %v1685_v17 }
 0xb6d   : > { %v2313_v18 = vmul.f32 %v2272_v4, %v4371_v6  ;;  %v3352_v6 = vld [vmem:[%s4343_s2 + $0x70] sm:$0xff]  }
 0xb6f   : > { %v2292_v28 = vpop.permute.xlu1 %2291 }
 0xb70   : > { %v2257_v21 = vpop.permute.xlu0 %2256  ;;  %v2317_v24 = vmul.f32 %v2292_v28, %v4367_v15  ;;  %v4376_v15 = vmax.f32 %v3892_v41, 0.0 }
 0xb71   : > { %v2310_v63 = vmul.f32 %v2257_v21, %v4372_v34  ;;  %v2794_v34 = vld [vmem:[%s4344_s3 + $0x7] ss:$0 sm:$0xff] }
 0xb73   : > { %v3279_v37 = vpop.permute.xlu1 %3278 }
 0xb74   : > { %v3281_v48 = vunpack.i.h.bf16 %v3279_v37  ;;  %v3280_v2 = vunpack.i.l.bf16 %v3279_v37  ;;  %v3294_v22 = vpop.permute.xlu0 %3293 }
 0xb75   : > { %v3296_v58 = vunpack.i.h.bf16 %v3294_v22  ;;  %v3295_v60 = vunpack.i.l.bf16 %v3294_v22 }
 0xb76   : > { %v2383_v51 = vsel %vm677_vm1, %v2319_v23, %v3281_v48  ;;  %v2382_v7 = vsel %vm677_vm1, %v2318_v1, %v3280_v2 }
 0xb77   : > { %v2391_v10 = vpack.c.bf16 %v2383_v51, %v2382_v7  ;;  %v2277_v38 = vpop.permute.xlu1 %2276  ;;  %v2377_v3 = vsel %vm677_vm1, %v2313_v18, %v3296_v58  ;;  %v2214_v7 = vshrl.u32 %v2211_v8, 7  ;;  %v3587_v58 = vmov 1.0|1.0  }
 0xb78   : > { %v2314_v44 = vmul.f32 %v2277_v38, %v4368_v31  ;;  %v2252_v13 = vpop.permute.xlu0 %2251 }
 0xb79   : > { %3183 = vmatpush3.bf16.msra.mxu1 %v2391_v10  ;;  %v4375_v10 = vmax.f32 %v3916_v57, 0.0  ;;  %v2215_v22 = vmul.u32 16, %v2214_v7 }
 0xb7a   : > { %3184 = vmatprep.subr.bf16.mxu1 %v3585_v42 }
 0xb7b   : > { %v2282_v45 = vpop.permute.xlu1 %2281  ;;  %v2309_v38 = vmul.f32 %v2252_v13, %v4375_v10 }
 0xb7c   : > { %v2315_v12 = vmul.f32 %v2282_v45, %v4369_v16  ;;  %v2237_v5 = vpop.permute.xlu0 %2236 }
 0xb7f   : > { %v3284_v29 = vpop.permute.xlu1 %3283 }
 0xb80   : > { %v3286_v26 = vunpack.i.h.bf16 %v3284_v29  ;;  %v3285_v27 = vunpack.i.l.bf16 %v3284_v29  ;;  %v3304_v59 = vpop.permute.xlu0 %3303 }
 0xb81   : > { %v3306_v1 = vunpack.i.h.bf16 %v3304_v59  ;;  %v3305_v48 = vunpack.i.l.bf16 %v3304_v59 }
 0xb82   : > { %v2381_v30 = vsel %vm677_vm1, %v2317_v24, %v3286_v26  ;;  %v2380_v53 = vsel %vm677_vm1, %v2316_v14, %v3285_v27  ;;  %v2217_v14 = vadd.s32 1, %v2214_v7  ;;  %v2306_v24 = vmul.f32 %v2237_v5, %v4376_v15  ;;  %v3354_v5 = vld [vmem:[%s4343_s2 + $0x90] sm:$0xff]  }
 0xb83   : > { %v2390_v50 = vpack.c.bf16 %v2381_v30, %v2380_v53  ;;  %v2267_v35 = vpop.permute.xlu1 %2266  ;;  %v2373_v52 = vsel %vm677_vm1, %v2309_v38, %v3306_v1  ;;  %v2212_v27 = vand.u32 127, %v2211_v8  ;;  %v4377_v53 = vmax.f32 %v3890_v40, 0.0 }
 0xb84   : > { %v2312_v11 = vmul.f32 %v2267_v35, %v4370_v33  ;;  %v2232_v21 = vpop.permute.xlu0 %2231  ;;  %v2218_v30 = vmul.u32 16, %v2217_v14  ;;  %v4378_v35 = vmax.f32 %v3888_v39, 0.0 }
 0xb85   : > { %3185 = vmatpush3.bf16.msra.mxu1 %v2390_v50  ;;  %vm2216_vm4 = vcmp.ge.s32.totalorder %v2212_v27, %v2215_v22 }
 0xb86   : > { %3186 = vmatprep.subr.bf16.mxu1 %v3585_v42  ;;  %v2376_v19 = vsel %vm677_vm1, %v2312_v11, %v3295_v60  ;;  %vm2219_vm5 = vcmp.lt.s32.totalorder %v2212_v27, %v2218_v30  ;;  %v4379_v11 = vmax.f32 %v3894_v43, 0.0  ;;  %v3588_v43 = vmov 32   ;;  %v3351_v60 = vld [vmem:[%s4343_s2 + $0x78] sm:$0xff]  }
 0xb87   : > { %v3289_v17 = vpop.permute.xlu1 %3288  ;;  %v2388_v20 = vpack.c.bf16 %v2377_v3, %v2376_v19  ;;  %vm2220_vm6 = vmand %vm2216_vm4, %vm2219_vm5  ;;  %3317 = vset.pattern.permute.xlu1 %v3588_v43  ;;  %3318 = vset.pattern.permute.xlu0 %v3588_v43  ;;  %v3353_v19 = vld [vmem:[%s4343_s2 + $0x98] sm:$0xff]  }
 0xb88   : > { %v3291_v47 = vunpack.i.h.bf16 %v3289_v17  ;;  %v3290_v49 = vunpack.i.l.bf16 %v3289_v17  ;;  %v3314_v26 = vpop.permute.xlu0 %3313  ;;  %vm2792_vm7 = vmpackc.low %vm2220_vm6, %vm2220_vm6  ;;  %3211 = vmatpush3.bf16.msra.mxu0 %v3353_v19 }
 0xb89   : > { %v3316_v17 = vunpack.i.h.bf16 %v3314_v26  ;;  %v3315_v16 = vunpack.i.l.bf16 %v3314_v26  ;;  %3212 = vmatprep.subr.bf16.mxu0 %v3585_v42 }
 0xb8a   : > { %v2379_v61 = vsel %vm677_vm1, %v2315_v12, %v3291_v47  ;;  %v2378_v62 = vsel %vm677_vm1, %v2314_v44, %v3290_v49  ;;  %v2305_v47 = vmul.f32 %v2232_v21, %v4379_v11 }
 0xb8b   : > { %v2389_v0 = vpack.c.bf16 %v2379_v61, %v2378_v62  ;;  %v2262_v9 = vpop.permute.xlu1 %2261 }
 0xb8c   : > { %v2311_v36 = vmul.f32 %v2262_v9, %v4373_v46  ;;  %v2369_v39 = vsel %vm677_vm1, %v2305_v47, %v3316_v17  ;;  %3213 = vmatpush3.bf16.msra.mxu0 %v3354_v5 }
 0xb8d   : > { %3187 = vmatpush3.bf16.msra.mxu1 %v2389_v0 }
 0xb8e   : > { %3188 = vmatprep.subr.bf16.mxu1 %v3585_v42 }
 0xb8f   : > { %v2247_v25 = vpop.permute.xlu1 %2246 }
 0xb90   : > { %v2308_v28 = vmul.f32 %v2247_v25, %v4374_v32 }
 0xb91   : > { %3189 = vmatpush3.bf16.msra.mxu1 %v2388_v20 }
 0xb92   : > { %3190 = vmatprep.subr.bf16.mxu1 %v3585_v42  ;;  %v2372_v54 = vsel %vm677_vm1, %v2308_v28, %v3305_v48 }
 0xb93   : > { %v3299_v56 = vpop.permute.xlu1 %3298  ;;  %v2386_v45 = vpack.c.bf16 %v2373_v52, %v2372_v54 }
 0xb94   : > { %v3301_v37 = vunpack.i.h.bf16 %v3299_v56  ;;  %v3300_v23 = vunpack.i.l.bf16 %v3299_v56 }
 0xb96   : > { %v2375_v2 = vsel %vm677_vm1, %v2311_v36, %v3301_v37  ;;  %v2374_v4 = vsel %vm677_vm1, %v2310_v63, %v3300_v23 }
 0xb97   : > { %v2387_v51 = vpack.c.bf16 %v2375_v2, %v2374_v4  ;;  %v2242_v55 = vpop.permute.xlu1 %2241 }
 0xb98   : > { %v2307_v50 = vmul.f32 %v2242_v55, %v4377_v53 }
 0xb99   : > { %3191 = vmatpush3.bf16.msra.mxu1 %v2387_v51 }
 0xb9a   : > { %3192 = vmatprep.subr.bf16.mxu1 %v3585_v42 }
 0xb9b   : > { %v2227_v29 = vpop.permute.xlu1 %2226 }
 0xb9c   : > { %v2304_v31 = vmul.f32 %v2227_v29, %v4378_v35 }
 0xb9d   : > { %3193 = vmatpush3.bf16.msra.mxu1 %v2386_v45 }
 0xb9e   : > { %3194 = vmatprep.subr.bf16.mxu1 %v3585_v42  ;;  %v2368_v40 = vsel %vm677_vm1, %v2304_v31, %v3315_v16 }
 0xb9f   : > { %v3309_v57 = vpop.permute.xlu1 %3308  ;;  %v2384_v49 = vpack.c.bf16 %v2369_v39, %v2368_v40 }
 0xba0   : > { %v3311_v44 = vunpack.i.h.bf16 %v3309_v57  ;;  %v3310_v13 = vunpack.i.l.bf16 %v3309_v57 }
 0xba2   : > { %v2371_v12 = vsel %vm677_vm1, %v2307_v50, %v3311_v44  ;;  %v2370_v41 = vsel %vm677_vm1, %v2306_v24, %v3310_v13 }
 0xba3   : > { %v2385_v33 = vpack.c.bf16 %v2371_v12, %v2370_v41 }
 0xba5   : > { %3195 = vmatpush3.bf16.msra.mxu1 %v2385_v33 }
 0xba6   : > { %3196 = vmatprep.subr.bf16.mxu1 %v3585_v42 }
 0xba9   : > { %3197 = vmatpush3.bf16.msra.mxu1 %v2384_v49 }
 0xbaa   : > { %3202 = vmatprep.subr.bf16.mxu1 %v3585_v42 }
 0xbac   : > { %3199 = vmatmul.mubr.msk.bf16.vlgmr.msra.gmra.mxu1 %vm2792_vm7, %v3587_v58 }
 0xbad   : > { %3206 = vmatprep.mubr.msk.bf16.mxu1 %vm3586_vm3, %v3585_v42  ;;  %3203 = vmatpush3.bf16.msra.mxu1 %v3351_v60 }
 0xbae   : > { %3204 = vmatprep.subr.bf16.mxu1 %v3585_v42  ;;  %v2798_v42 = vld [vmem:[%s4344_s3 + $0xa] ss:$0 sm:$0xff] }
 0xbb1   : > { %3205 = vmatpush3.bf16.msra.mxu1 %v3352_v6 }
 0xc6c   : > { %v2426_v61 = vpop.f32.mrf.mxu1 }
 0xc6d   : > { %3483 = vrcp.f32 %v2426_v61 }
 0xc6e   : > { %v3200_v62 = vpop.f32.mrf.mxu1 }
 0xc70   : > { %v2429_v0 = vpop.f32.mrf.mxu1 }
 0xc72   : > { %v3201_v9 = vpop.f32.mrf.mxu1 }
 0xc7a   : > { %v3484_v18 = vpop.eup %3483 }
 0xc7b   : > { %2435 = vperm.xlu1 %3317, %v3484_v18  }
 0xcf6   : > { %v2436_v3 = vpop.permute.xlu1 %2435 }
 0xcf7   : > { %v2438_v20 = vmul.f32 %v2436_v3, %v2426_v61 }
 0xcf9   : > { %v2444_v25 = vpack.c.bf16 %v2438_v20, %v2438_v20 }
 0xcfb   : > { %3207 = vmatmul.mubr.msk.bf16.vlgmr.msra.gmra.mxu1 %vm677_vm1, %v2444_v25 }
 0xdbb   : > { %v2498_v63 = vpop.f32.mrf.mxu1 }
 0xdbc   : > { %v2499_v59 = vadd.f32 %v2794_v34, %v2498_v63 }
 0xdbd   : > { %v3208_v56 = vpop.f32.mrf.mxu1 }
 0xdbe   : > { %v2504_v8 = vmax.f32 %v2499_v59, 0.0 }
 0xdbf   : > { %v2501_v46 = vpop.f32.mrf.mxu1 }
 0xdc0   : > { %v2510_v36 = vpack.c.bf16 %v2504_v8, %v2504_v8 }
 0xdc1   : > { %v3209_v32 = vpop.f32.mrf.mxu1 }
 0xdc2   : > { %3215 = vmatmul.mubr.msk.bf16.vlgmr.msra.gmra.mxu0 %vm677_vm1, %v2510_v36 }
 0xe82   : > { %v2564_v28 = vpop.f32.mrf.mxu0 }
 0xe83   : > { %v2565_v37 = vadd.f32 %v2798_v42, %v2564_v28 }
 0xe84   : > { %v3216_v23 = vpop.f32.mrf.mxu0 }
 0xe85   : > { %2570 = vst [vmem:[%s231_s30] sm:$0xff] %v2565_v37 }
 0xe86   : > { %v2567_v1 = vpop.f32.mrf.mxu0 }
 0xe87   : > { %3526 = shalt.err (!%p3523_p0)
}
 0xe88   : > { %s3527_s10 = scalar_lea.hbm %s4298_s9, 128  ;;  %s3531_s12 = scalar_lea.hbm %s4345_s4, 256 }
 0xe89   : > { %p3528_p2 = scmp.ne.s32.totalorder %s4298_s9, %s3527_s10  ;;  %p3532_p3 = scmp.lt.s32.totalorder %s4298_s9, %s4345_s4 }
 0xe8a   : > { %p3533_p6 = scmp.lt.s32.totalorder %s3531_s12, %s3527_s10 }
 0xe8b   : > { %p3529_p9 = pnand %p3528_p2, %p4380_p13 }
 0xe8c   : > { %p3534_p11 = por %p3533_p6, %p3532_p3 }
 0xe8d   : > { %p3530_p1 = pneg %p3529_p9 }
 0xe8f   : > { %p3535_p12 = pnand %p3534_p11, %p3530_p1 }
 0xe91   : > { %3538 = shalt.err (!%p3535_p12)
}
 0xe92   : > { %3222 = dma.vmem_to_hbm [thread:$0]  (%p4380_p13), %s4300_s5, 128, %s4298_s9, %s2572_s14   ;;  %v3217_v48 = vpop.f32.mrf.mxu0 }
 0xe93 PF: > { %s2597_s25 = sand.u32 1, %s3565_s15   ;;  %p4381_p4 = scmp.ne.s32.totalorder %s4364_s28, 0 }
 0xe94   : > { %p4382_p5 = scmp.ge.s32.totalorder %s3577_s18, 2  ;;  %s2598_s29 = scalar_lea.sflag [#allocation4], %s2597_s25 }
 0xe96   : > { %p3229_p7 = pnand %p4382_p5, %p4381_p4 }
 0xe98   : > { %p3230_p8 = pneg %p3229_p7 }
 0xe9a   : > { %3560 = dma.done.wait (%p3230_p8), %s2598_s29, 128  }
 0xe9b   : > { %3562 = vsyncadd (%p3230_p8), %s2598_s29, 4294967168  ;;  %p17_p10 = scmp.ge.s32.totalorder %s3640_s21, 4   ;;  %s4383_s15 = smov %s3569_s16 }
 0xe9c   : > { %s4384_s16 = smov %s3573_s17  ;;  %s4385_s17 = smov %s3652_s24 }
 0xe9d   : > { %s4386_s18 = smov %s3640_s21  ;;  %19 = sbr.rel (!%p17_p10) target bundleno = 5 (0x5), region = 84 }
 0xea2   :  { %2603 = vsyncpa [#allocation3], 1 }
 0xea3   :  { %2605 = vsyncpa [#allocation3 + $0x1], 1 }
 0xea4   :  { %2606 = vsyncpa [#allocation4], 1 }
 0xea5   :  { %2608 = vsyncpa [#allocation4 + $0x1], 1 }

</bundles_post_ra>
